<compile_context>
chip_gen: v5e
topology: v5e:2x2
jax: 0.10.0
libtpu: 0.0.40
codegen_flags: <defaults>
</compile_context>

<pallas_src>
import jax
import jax.numpy as jnp
from jax import lax
from jax.experimental import pallas as pl
from jax.experimental.pallas import tpu as pltpu


def pn_head_kernel(scale_ref, labels_ref, q_ref, s_ref, out_ref):
    # scale_ref:  [1] f32 (SMEM)
    # labels_ref: [1, NS] int32 (VMEM, tiny)
    # q_ref:      [TQ, C, HW] query tile   (HW on lanes)
    # s_ref:      [NS, C, HW] full support (HW on lanes, resident)
    # out_ref:    [TQ, WAY] f32
    eps = 1e-12
    way = out_ref.shape[-1]
    ns = s_ref.shape[0]

    # adaptive_avg_pool2d(x, 1) == spatial mean; lane reduce over HW.
    # astype(f32) promotes the already-resident tile (no-op for f32 inputs,
    # required for bf16 backbones so the sum-of-squares stays in f32).
    q = jnp.mean(q_ref[...].astype(jnp.float32), axis=-1)        # [TQ, C]
    s = jnp.mean(s_ref[...].astype(jnp.float32), axis=-1)        # [NS, C]

    # F.normalize(x, p=2, dim=1, eps) == x * rsqrt(max(||x||^2, eps^2)).
    # rsqrt lowers to the EUP (its own VLIW slot). scale_cls is folded into
    # the query factor so there is no separate scale pass on the scores.
    q_fac = scale_ref[0] * lax.rsqrt(
        jnp.maximum(jnp.sum(q * q, axis=-1, keepdims=True), eps * eps))
    s_fac = lax.rsqrt(
        jnp.maximum(jnp.sum(s * s, axis=-1, keepdims=True), eps * eps))
    qn = q * q_fac                                               # [TQ, C] (pre-scaled)
    sn = s * s_fac                                               # [NS, C]

    # In-kernel one-hot: onehot_t[k, s] = (labels[s] == k). Prototypes land
    # directly in [WAY, C] with sn as the canonical [NS, C] RHS.
    cls = lax.broadcasted_iota(jnp.int32, (way, ns), 0)          # [WAY, NS]
    onehot_t = (cls == labels_ref[...]).astype(jnp.float32)      # [WAY, NS]
    proto = jnp.dot(onehot_t, sn,
                    preferred_element_type=jnp.float32)          # [WAY, C]
    # Per-class count division dropped: a positive per-class scalar cancels
    # under the subsequent L2 normalization (empty class -> zero scores).
    p_fac = lax.rsqrt(
        jnp.maximum(jnp.sum(proto * proto, axis=-1, keepdims=True), eps * eps))
    pn = proto * p_fac                                           # [WAY, C]

    # scores = scale_cls * q_norm @ proto_norm^T : contract last-vs-last so
    # only the tiny [WAY, C] prototype needs (internal) transposition.
    out_ref[...] = jnp.einsum("qc,kc->qk", qn, pn,
                              preferred_element_type=jnp.float32)


def pn_head_forward(query_images, support_images, support_labels, scale_cls,
                    num_classes, *, query_tile=None):
    """query_images: [NQ, C, H, W], support_images: [NS, C, H, W] (NCHW, any
    float dtype — kept through the DMA), support_labels: [NS] int,
    scale_cls: scalar parameter. Returns [NQ, num_classes] float32 logits."""
    nq, c, h, w = query_images.shape
    ns = support_images.shape[0]
    hw = h * w

    # NCHW -> [N, C, HW] is a contiguous, layout-only reshape: no HBM->HBM
    # transpose pass and no dtype change ahead of the kernel's DMA.
    q_in = query_images.reshape(nq, c, hw)
    s_in = support_images.reshape(ns, c, hw)
    labels = support_labels.astype(jnp.int32).reshape(1, ns)
    scale = jnp.asarray(scale_cls, jnp.float32).reshape(1)

    if query_tile is None:
        # Single step for small episodes; otherwise 32-row query tiles
        # (multiple of 8 for the output block) so per-step VMEM stays bounded
        # even though HW (< 128) pads to 128 lanes once resident in VMEM.
        # TODO(synk): re-derive the tile (and set vmem_limit_bytes) against
        # v7x's 64 MiB VMEM if episodes are ever batched.
        query_tile = nq if nq <= 32 else 32
    num_tiles = pl.cdiv(nq, query_tile)
    nq_pad = num_tiles * query_tile
    if nq_pad != nq:
        q_in = jnp.pad(q_in, ((0, nq_pad - nq), (0, 0), (0, 0)))

    bytes_in = (q_in.size * q_in.dtype.itemsize
                + s_in.size * s_in.dtype.itemsize + labels.size * 4 + 4)
    cost = pl.CostEstimate(
        flops=(nq_pad + ns) * hw * c                   # spatial mean
              + 3 * (nq_pad + ns + num_classes) * c    # normalization
              + 2 * c * num_classes * (ns + nq_pad),   # proto + scores matmuls
        transcendentals=nq_pad + ns + num_classes,
        bytes_accessed=bytes_in + nq_pad * num_classes * 4,
    )

    grid_spec = pltpu.PrefetchScalarGridSpec(
        num_scalar_prefetch=0,
        grid=(num_tiles,),
        in_specs=[
            pl.BlockSpec(memory_space=pltpu.MemorySpace.SMEM),       # scale_cls
            pl.BlockSpec(memory_space=pltpu.MemorySpace.VMEM),       # labels (tiny)
            pl.BlockSpec((query_tile, c, hw), lambda i: (i, 0, 0)),  # query tile
            pl.BlockSpec((ns, c, hw), lambda i: (0, 0, 0)),          # support, resident
        ],
        out_specs=pl.BlockSpec((query_tile, num_classes), lambda i: (i, 0)),
    )

    out = pl.pallas_call(
        pn_head_kernel,
        out_shape=jax.ShapeDtypeStruct((nq_pad, num_classes), jnp.float32),
        grid_spec=grid_spec,
        compiler_params=pltpu.CompilerParams(
            dimension_semantics=("parallel",)),
        cost_estimate=cost,
    )(scale, labels, q_in, s_in)
    return out[:nq] if nq_pad != nq else out


if __name__ == "__main__":
    key = jax.random.PRNGKey(0)
    kq, ks = jax.random.split(key)

    way, shot = 5, 2
    num_query = 8
    c, h, w = 32, 4, 4
    num_support = way * shot

    query_images = jax.random.normal(kq, (num_query, c, h, w), jnp.float32)
    support_images = jax.random.normal(ks, (num_support, c, h, w), jnp.float32)
    # labels [NS]: 0,0,1,1,2,2,3,3,4,4
    support_labels = jnp.repeat(jnp.arange(way, dtype=jnp.int32), shot)

    # nn.Parameter(torch.FloatTensor(1).fill_(10.0)) -> deterministic scalar
    scale_cls = jnp.array([10.0], jnp.float32)

    scores = pn_head_forward(query_images, support_images, support_labels,
                             scale_cls, num_classes=way)
    jax.block_until_ready(scores)
    assert scores.shape == (num_query, way)
    print("KERNEL_OK")
</pallas_src>

<mosaic_0001>
module attributes {stable_mosaic.version = 11 : i64} {
  func.func @pn_head_kernel(%arg0: i32, %arg1: memref<1xf32, #tpu.memory_space<smem>>, %arg2: memref<1x10xi32, #tpu.memory_space<vmem>>, %arg3: memref<8x32x16xf32, #tpu.memory_space<vmem>>, %arg4: memref<10x32x16xf32, #tpu.memory_space<vmem>>, %arg5: memref<8x5xf32, #tpu.memory_space<vmem>>) attributes {dimension_semantics = [#tpu.dimension_semantics<parallel>], iteration_bounds = array<i64: 1>, scalar_prefetch = 0 : i64, scratch_operands = 0 : i64, tpu.core_type = #tpu.core_type<tc>, window_params = [{transform_indices = @transform_0, window_bounds = array<i64: 1>}, {pipeline_mode = #tpu.pipeline_mode<synchronous>, transform_indices = @transform_1, window_bounds = array<i64: 1, 10>}, {transform_indices = @transform_2, window_bounds = array<i64: 8, 32, 16>}, {pipeline_mode = #tpu.pipeline_mode<synchronous>, transform_indices = @transform_3, window_bounds = array<i64: 10, 32, 16>}, {transform_indices = @transform_4, window_bounds = array<i64: 8, 5>}]} {
    %c0 = arith.constant 0 : index
    %c0_0 = arith.constant 0 : index
    %c0_1 = arith.constant 0 : index
    %0 = vector.load %arg3[%c0, %c0_0, %c0_1] : memref<8x32x16xf32, #tpu.memory_space<vmem>>, vector<8x32x16xf32>
    %cst = arith.constant dense<0.000000e+00> : vector<8x32xf32>
    %1 = vector.multi_reduction <add>, %0, %cst [2] : vector<8x32x16xf32> to vector<8x32xf32>
    %cst_2 = arith.constant 1.600000e+01 : f32
    %2 = vector.broadcast %cst_2 : f32 to vector<8x32xf32>
    %3 = arith.divf %1, %2 : vector<8x32xf32>
    %c0_3 = arith.constant 0 : index
    %c0_4 = arith.constant 0 : index
    %c0_5 = arith.constant 0 : index
    %4 = vector.load %arg4[%c0_3, %c0_4, %c0_5] : memref<10x32x16xf32, #tpu.memory_space<vmem>>, vector<10x32x16xf32>
    %cst_6 = arith.constant dense<0.000000e+00> : vector<10x32xf32>
    %5 = vector.multi_reduction <add>, %4, %cst_6 [2] : vector<10x32x16xf32> to vector<10x32xf32>
    %cst_7 = arith.constant 1.600000e+01 : f32
    %6 = vector.broadcast %cst_7 : f32 to vector<10x32xf32>
    %7 = arith.divf %5, %6 : vector<10x32xf32>
    %c0_8 = arith.constant 0 : index
    %8 = memref.load %arg1[%c0_8] : memref<1xf32, #tpu.memory_space<smem>>
    %9 = arith.mulf %3, %3 : vector<8x32xf32>
    %cst_9 = arith.constant dense<0.000000e+00> : vector<8xf32>
    %10 = vector.multi_reduction <add>, %9, %cst_9 [1] : vector<8x32xf32> to vector<8xf32>
    %11 = vector.shape_cast %10 : vector<8xf32> to vector<8x1xf32>
    %cst_10 = arith.constant 1.000000e-24 : f32
    %12 = vector.broadcast %cst_10 : f32 to vector<8x1xf32>
    %13 = arith.maximumf %11, %12 : vector<8x1xf32>
    %14 = math.rsqrt %13 : vector<8x1xf32>
    %15 = vector.broadcast %8 : f32 to vector<8x1xf32>
    %16 = arith.mulf %15, %14 : vector<8x1xf32>
    %17 = arith.mulf %7, %7 : vector<10x32xf32>
    %cst_11 = arith.constant dense<0.000000e+00> : vector<10xf32>
    %18 = vector.multi_reduction <add>, %17, %cst_11 [1] : vector<10x32xf32> to vector<10xf32>
    %19 = vector.shape_cast %18 : vector<10xf32> to vector<10x1xf32>
    %cst_12 = arith.constant 1.000000e-24 : f32
    %20 = vector.broadcast %cst_12 : f32 to vector<10x1xf32>
    %21 = arith.maximumf %19, %20 : vector<10x1xf32>
    %22 = math.rsqrt %21 : vector<10x1xf32>
    %23 = vector.broadcast %16 : vector<8x1xf32> to vector<8x32xf32>
    %24 = arith.mulf %3, %23 : vector<8x32xf32>
    %25 = vector.broadcast %22 : vector<10x1xf32> to vector<10x32xf32>
    %26 = arith.mulf %7, %25 : vector<10x32xf32>
    %27 = tpu.iota {dimensions = array<i32: 0>} : vector<5x10xi32>
    %c0_13 = arith.constant 0 : index
    %c0_14 = arith.constant 0 : index
    %28 = vector.load %arg2[%c0_13, %c0_14] : memref<1x10xi32, #tpu.memory_space<vmem>>, vector<1x10xi32>
    %29 = vector.broadcast %28 : vector<1x10xi32> to vector<5x10xi32>
    %30 = arith.cmpi eq, %27, %29 : vector<5x10xi32>
    %31 = arith.extui %30 : vector<5x10xi1> to vector<5x10xi32>
    %32 = arith.sitofp %31 : vector<5x10xi32> to vector<5x10xf32>
    %cst_15 = arith.constant dense<0.000000e+00> : vector<5x32xf32>
    %33 = tpu.matmul %32, %26, %cst_15 {dimension_numbers = #tpu.dot_dimension_numbers<[1], [0], [0], [1], [0, 0, 1, 1], [], []>} : vector<5x10xf32>, vector<10x32xf32>, vector<5x32xf32> -> vector<5x32xf32>
    %34 = arith.mulf %33, %33 : vector<5x32xf32>
    %cst_16 = arith.constant dense<0.000000e+00> : vector<5xf32>
    %35 = vector.multi_reduction <add>, %34, %cst_16 [1] : vector<5x32xf32> to vector<5xf32>
    %36 = vector.shape_cast %35 : vector<5xf32> to vector<5x1xf32>
    %cst_17 = arith.constant 1.000000e-24 : f32
    %37 = vector.broadcast %cst_17 : f32 to vector<5x1xf32>
    %38 = arith.maximumf %36, %37 : vector<5x1xf32>
    %39 = math.rsqrt %38 : vector<5x1xf32>
    %40 = vector.broadcast %39 : vector<5x1xf32> to vector<5x32xf32>
    %41 = arith.mulf %33, %40 : vector<5x32xf32>
    "tpu.trace_start"() <{level = 10 : i32, message = "qc,kc->qk"}> : () -> ()
    %cst_18 = arith.constant dense<0.000000e+00> : vector<8x5xf32>
    %42 = tpu.matmul %24, %41, %cst_18 {dimension_numbers = #tpu.dot_dimension_numbers<[1], [1], [0], [0], [0, 0, 1, 0], [], []>} : vector<8x32xf32>, vector<5x32xf32>, vector<8x5xf32> -> vector<8x5xf32>
    "tpu.trace_stop"() : () -> ()
    %c0_19 = arith.constant 0 : index
    %c0_20 = arith.constant 0 : index
    %43 = vector.load %arg5[%c0_19, %c0_20] : memref<8x5xf32, #tpu.memory_space<vmem>>, vector<8x5xf32>
    tpu.vector_store %arg5[%c0_19, %c0_20], %42 {strides = array<i32>} : memref<8x5xf32, #tpu.memory_space<vmem>>, vector<8x5xf32>,
    return
  }
  func.func @transform_0(%arg0: i32) -> i32 {
    %c0_i32 = arith.constant 0 : i32
    %c0_i32_0 = arith.constant 0 : i32
    return %c0_i32 : i32
  }
  func.func @transform_1(%arg0: i32) -> (i32, i32) {
    %c0_i32 = arith.constant 0 : i32
    %c0_i32_0 = arith.constant 0 : i32
    %c0_i32_1 = arith.constant 0 : i32
    return %c0_i32, %c0_i32_0 : i32, i32
  }
  func.func @transform_2(%arg0: i32) -> (i32, i32, i32) {
    %c0_i32 = arith.constant 0 : i32
    %c0_i32_0 = arith.constant 0 : i32
    %c0_i32_1 = arith.constant 0 : i32
    return %arg0, %c0_i32, %c0_i32_0 : i32, i32, i32
  }
  func.func @transform_3(%arg0: i32) -> (i32, i32, i32) {
    %c0_i32 = arith.constant 0 : i32
    %c0_i32_0 = arith.constant 0 : i32
    %c0_i32_1 = arith.constant 0 : i32
    %c0_i32_2 = arith.constant 0 : i32
    return %c0_i32, %c0_i32_0, %c0_i32_1 : i32, i32, i32
  }
  func.func @transform_4(%arg0: i32) -> (i32, i32) {
    %c0_i32 = arith.constant 0 : i32
    %c0_i32_0 = arith.constant 0 : i32
    return %arg0, %c0_i32 : i32, i32
  }
}

</mosaic_0001>

<bundles_post_ra>
// kernel: tpu_custom_call.1
= control target key start
LH: loop header
LB: loop body
LE: loop exit
PB: predicated region body
PF: predicated region fallthrough
CT: control target
= control target key end

     0   :  { %vm51_vm0 = vcmask 130048   ;;  %s2772_s0 = inlined_call_operand.<no memory space> [shape: f32[1], index: 0, kind: input, shape index: {}]   ;;  %s2773_s1 = inlined_call_operand.vmem [shape: s32[1,10], index: 1, kind: input, shape index: {}]   ;;  %s2774_s2 = inlined_call_operand.vmem [shape: f32[8,32,16], index: 2, kind: input, shape index: {}]   ;;  %s2775_s3 = inlined_call_operand.vmem [shape: f32[10,32,16], index: 3, kind: input, shape index: {}]   ;;  %s2776_s4 = inlined_call_operand.hbm [shape: f32[8,5], index: 4, kind: output, shape index: {}]  }
   0x1   :  { %v23_v0 = vld [vmem:[%s2774_s2 + $0x20] sm:$0xff]  ;;  %v21_v1 = vld [vmem:[%s2774_s2 + $0x10] sm:$0xff]  ;;  %v24_v6 = vld [vmem:[%s2774_s2 + $0x28] sm:$0xff] }
   0x2   :  { %v19_v2 = vld [vmem:[%s2774_s2] sm:$0xff]  ;;  %v64_v3 = vsel %vm51_vm0, %v23_v0, 0.0  ;;  %v58_v4 = vsel %vm51_vm0, %v21_v1, 0.0  ;;  %v22_v7 = vld [vmem:[%s2774_s2 + $0x18] sm:$0xff]  ;;  %v20_v8 = vld [vmem:[%s2774_s2 + $0x8] sm:$0xff] }
   0x3   :  { %v52_v5 = vsel %vm51_vm0, %v19_v2, 0.0  ;;  %65 = vadd.xlane.f32.xlu2 %v64_v3  ;;  %59 = vadd.xlane.f32.xlu1 %v58_v4 }
   0x4   :  { %53 = vadd.xlane.f32.xlu0 %v52_v5 }
   0x5   :  { %10 = vsyncpa [#allocation4], 0  ;;  %v67_v9 = vsel %vm51_vm0, %v24_v6, 0.0  ;;  %v61_v10 = vsel %vm51_vm0, %v22_v7, 0.0  ;;  %v55_v11 = vsel %vm51_vm0, %v20_v8, 0.0  ;;  %v26_v12 = vld [vmem:[%s2774_s2 + $0x38] sm:$0xff] }
   0x6   :  { %v27_v13 = vld [vmem:[%s2774_s2 + $0x40] sm:$0xff]  ;;  %v25_v14 = vld [vmem:[%s2774_s2 + $0x30] sm:$0xff]  ;;  %v73_v15 = vsel %vm51_vm0, %v26_v12, 0.0  ;;  %v30_v19 = vld [vmem:[%s2774_s2 + $0x58] sm:$0xff]  ;;  %vm457_vm2 = vcmask 130112   ;;  %vm461_vm3 = vcmask 195712  }
   0x7   :  { %v76_v16 = vsel %vm51_vm0, %v27_v13, 0.0  ;;  %v70_v17 = vsel %vm51_vm0, %v25_v14, 0.0  ;;  %v29_v18 = vld [vmem:[%s2774_s2 + $0x50] sm:$0xff]  ;;  %v28_v20 = vld [vmem:[%s2774_s2 + $0x48] sm:$0xff]  ;;  %v85_v22 = vsel %vm51_vm0, %v30_v19, 0.0  ;;  %v31_v26 = vld [vmem:[%s2774_s2 + $0x60] sm:$0xff] }
   0x8   :  { %v82_v21 = vsel %vm51_vm0, %v29_v18, 0.0  ;;  %v79_v23 = vsel %vm51_vm0, %v28_v20, 0.0  ;;  %v32_v24 = vld [vmem:[%s2774_s2 + $0x68] sm:$0xff]  ;;  %v33_v25 = vld [vmem:[%s2774_s2 + $0x70] sm:$0xff]  ;;  %v88_v29 = vsel %vm51_vm0, %v31_v26, 0.0  ;;  %v35_v30 = vld [vmem:[%s2774_s2 + $0x80] sm:$0xff] }
   0x9   :  { %v91_v27 = vsel %vm51_vm0, %v32_v24, 0.0  ;;  %v94_v28 = vsel %vm51_vm0, %v33_v25, 0.0  ;;  %v36_v31 = vld [vmem:[%s2774_s2 + $0x88] sm:$0xff]  ;;  %v34_v32 = vld [vmem:[%s2774_s2 + $0x78] sm:$0xff]  ;;  %v100_v33 = vsel %vm51_vm0, %v35_v30, 0.0  ;;  %v39_v37 = vld [vmem:[%s2774_s2 + $0xa0] sm:$0xff] }
   0xa   :  { %v103_v34 = vsel %vm51_vm0, %v36_v31, 0.0  ;;  %v97_v35 = vsel %vm51_vm0, %v34_v32, 0.0  ;;  %v38_v36 = vld [vmem:[%s2774_s2 + $0x98] sm:$0xff]  ;;  %v37_v38 = vld [vmem:[%s2774_s2 + $0x90] sm:$0xff]  ;;  %v112_v40 = vsel %vm51_vm0, %v39_v37, 0.0  ;;  %v40_v44 = vld [vmem:[%s2774_s2 + $0xa8] sm:$0xff] }
   0xb   :  { %68 = vadd.xlane.f32.xlu2 %v67_v9  ;;  %62 = vadd.xlane.f32.xlu1 %v61_v10  ;;  %v109_v39 = vsel %vm51_vm0, %v38_v36, 0.0  ;;  %v106_v41 = vsel %vm51_vm0, %v37_v38, 0.0  ;;  %v41_v42 = vld [vmem:[%s2774_s2 + $0xb0] sm:$0xff]  ;;  %v42_v43 = vld [vmem:[%s2774_s2 + $0xb8] sm:$0xff]  ;;  %v115_v47 = vsel %vm51_vm0, %v40_v44, 0.0  ;;  %v44_v48 = vld [vmem:[%s2774_s2 + $0xc8] sm:$0xff] }
   0xc   :  { %56 = vadd.xlane.f32.xlu0 %v55_v11  ;;  %v118_v45 = vsel %vm51_vm0, %v41_v42, 0.0  ;;  %v121_v46 = vsel %vm51_vm0, %v42_v43, 0.0  ;;  %v45_v49 = vld [vmem:[%s2774_s2 + $0xd0] sm:$0xff]  ;;  %v43_v50 = vld [vmem:[%s2774_s2 + $0xc0] sm:$0xff]  ;;  %v127_v51 = vsel %vm51_vm0, %v44_v48, 0.0  ;;  %v48_v55 = vld [vmem:[%s2774_s2 + $0xe8] sm:$0xff] }
   0xd   :  { %v130_v52 = vsel %vm51_vm0, %v45_v49, 0.0  ;;  %v124_v53 = vsel %vm51_vm0, %v43_v50, 0.0  ;;  %v47_v54 = vld [vmem:[%s2774_s2 + $0xe0] sm:$0xff]  ;;  %v46_v56 = vld [vmem:[%s2774_s2 + $0xd8] sm:$0xff]  ;;  %v139_v58 = vsel %vm51_vm0, %v48_v55, 0.0  ;;  %v49_v62 = vld [vmem:[%s2774_s2 + $0xf0] sm:$0xff] }
   0xe   :  { %v136_v57 = vsel %vm51_vm0, %v47_v54, 0.0  ;;  %v133_v59 = vsel %vm51_vm0, %v46_v56, 0.0  ;;  %v50_v60 = vld [vmem:[%s2774_s2 + $0xf8] sm:$0xff]  ;;  %v187_v61 = vld [vmem:[%s2775_s3] sm:$0xff]  ;;  %v142_v1 = vsel %vm51_vm0, %v49_v62, 0.0  ;;  %v189_v2 = vld [vmem:[%s2775_s3 + $0x10] sm:$0xff] }
   0xf   :  { %v145_v63 = vsel %vm51_vm0, %v50_v60, 0.0  ;;  %v227_v0 = vsel %vm51_vm0, %v187_v61, 0.0  ;;  %v190_v3 = vld [vmem:[%s2775_s3 + $0x18] sm:$0xff]  ;;  %v188_v4 = vld [vmem:[%s2775_s3 + $0x8] sm:$0xff]  ;;  %v233_v5 = vsel %vm51_vm0, %v189_v2, 0.0  ;;  %v193_v9 = vld [vmem:[%s2775_s3 + $0x30] sm:$0xff] }
  0x10   :  { %v236_v6 = vsel %vm51_vm0, %v190_v3, 0.0  ;;  %v230_v7 = vsel %vm51_vm0, %v188_v4, 0.0  ;;  %v192_v8 = vld [vmem:[%s2775_s3 + $0x28] sm:$0xff]  ;;  %v191_v10 = vld [vmem:[%s2775_s3 + $0x20] sm:$0xff]  ;;  %v245_v12 = vsel %vm51_vm0, %v193_v9, 0.0  ;;  %v198_v20 = vld [vmem:[%s2775_s3 + $0x58] sm:$0xff] }
  0x11   :  { %v242_v11 = vsel %vm51_vm0, %v192_v8, 0.0  ;;  %v239_v13 = vsel %vm51_vm0, %v191_v10, 0.0  ;;  %v195_v14 = vld [vmem:[%s2775_s3 + $0x40] sm:$0xff]  ;;  %v201_v26 = vld [vmem:[%s2775_s3 + $0x70] sm:$0xff]  ;;  %v200_v30 = vld [vmem:[%s2775_s3 + $0x68] sm:$0xff]  ;;  %vm465_vm4 = vcmask 261312  }
  0x12   :  { %v269_v32 = vsel %vm51_vm0, %v201_v26, 0.0  ;;  %v205_v36 = vld [vmem:[%s2775_s3 + $0x90] sm:$0xff]  ;;  %v207_v44 = vld [vmem:[%s2775_s3 + $0xa0] sm:$0xff]  ;;  %v206_v48 = vld [vmem:[%s2775_s3 + $0x98] sm:$0xff]  ;;  %vm516_vm5 = vcmask 1041409   ;;  %vm518_vm6 = vcmask 1042434  }
  0x13   :  { %74 = vadd.xlane.f32.xlu1 %v73_v15  ;;  %77 = vadd.xlane.f32.xlu2 %v76_v16  ;;  %v196_v15 = vld [vmem:[%s2775_s3 + $0x48] sm:$0xff]  ;;  %v194_v16 = vld [vmem:[%s2775_s3 + $0x38] sm:$0xff]  ;;  %v281_v42 = vsel %vm51_vm0, %v205_v36, 0.0  ;;  %v287_v50 = vsel %vm51_vm0, %v207_v44, 0.0  ;;  %v211_v55 = vld [vmem:[%s2775_s3 + $0xc0] sm:$0xff]  ;;  %vm520_vm7 = vcmask 1043459  }
  0x14   :  { %71 = vadd.xlane.f32.xlu0 %v70_v17  ;;  %v251_v17 = vsel %vm51_vm0, %v195_v14, 0.0  ;;  %v254_v18 = vsel %vm51_vm0, %v196_v15, 0.0  ;;  %v248_v19 = vsel %vm51_vm0, %v194_v16, 0.0  ;;  %v210_v54 = vld [vmem:[%s2775_s3 + $0xb8] sm:$0xff]  ;;  %v299_v61 = vsel %vm51_vm0, %v211_v55, 0.0  ;;  %v215_v16 = vld [vmem:[%s2775_s3 + $0xe0] sm:$0xff] }
  0x15   :  { %v296_v60 = vsel %vm51_vm0, %v210_v54, 0.0  ;;  %v214_v2 = vld [vmem:[%s2775_s3 + $0xd8] sm:$0xff]  ;;  %v219_v26 = vld [vmem:[%s2775_s3 + $0x100] sm:$0xff]  ;;  %vm522_vm8 = vcmask 1044484   ;;  %vm524_vm9 = vcmask 1045509   ;;  %vm526_vm10 = vcmask 1046534  }
  0x16   :  { %v308_v9 = vsel %vm51_vm0, %v214_v2, 0.0  ;;  %vm528_vm11 = vcmask 1047559   ;;  %vm2814_vm12 = vcmask 261120   ;;  %vm711_vm13 = vcmask 254976   ;;  %s1363_s5 = sshll.u32 %s2776_s4, 4  ;;  %s1364_s5 = int_to_ptr.hbm [resolvable:$true] %s1363_s5 }
  0x1b   :  { %83 = vadd.xlane.f32.xlu1 %v82_v21  ;;  %86 = vadd.xlane.f32.xlu2 %v85_v22  ;;  %v199_v21 = vld [vmem:[%s2775_s3 + $0x60] sm:$0xff]  ;;  %v197_v22 = vld [vmem:[%s2775_s3 + $0x50] sm:$0xff] }
  0x1c   :  { %80 = vadd.xlane.f32.xlu0 %v79_v23  ;;  %v260_v23 = vsel %vm51_vm0, %v198_v20, 0.0  ;;  %v263_v24 = vsel %vm51_vm0, %v199_v21, 0.0  ;;  %v257_v25 = vsel %vm51_vm0, %v197_v22, 0.0  ;;  %v311_v21 = vsel %vm51_vm0, %v215_v16, 0.0 }
  0x1d   :  { %v2777_v22 = vlaneseq }
  0x23   :  { %92 = vadd.xlane.f32.xlu1 %v91_v27  ;;  %95 = vadd.xlane.f32.xlu2 %v94_v28  ;;  %v202_v27 = vld [vmem:[%s2775_s3 + $0x78] sm:$0xff] }
  0x24   :  { %89 = vadd.xlane.f32.xlu0 %v88_v29 }
  0x2b   :  { %101 = vadd.xlane.f32.xlu1 %v100_v33  ;;  %104 = vadd.xlane.f32.xlu2 %v103_v34  ;;  %v272_v33 = vsel %vm51_vm0, %v202_v27, 0.0  ;;  %v266_v34 = vsel %vm51_vm0, %v200_v30, 0.0 }
  0x2c   :  { %98 = vadd.xlane.f32.xlu0 %v97_v35  ;;  %v204_v35 = vld [vmem:[%s2775_s3 + $0x88] sm:$0xff] }
  0x33   :  { %110 = vadd.xlane.f32.xlu1 %v109_v39  ;;  %113 = vadd.xlane.f32.xlu2 %v112_v40  ;;  %v203_v39 = vld [vmem:[%s2775_s3 + $0x80] sm:$0xff] }
  0x34   :  { %107 = vadd.xlane.f32.xlu0 %v106_v41  ;;  %v278_v41 = vsel %vm51_vm0, %v204_v35, 0.0  ;;  %v275_v43 = vsel %vm51_vm0, %v203_v39, 0.0  ;;  %v323_v39 = vsel %vm51_vm0, %v219_v26, 0.0  ;;  %v225_v26 = vld [vmem:[%s2775_s3 + $0x130] sm:$0xff] }
  0x3b   :  { %119 = vadd.xlane.f32.xlu1 %v118_v45  ;;  %122 = vadd.xlane.f32.xlu2 %v121_v46  ;;  %v208_v45 = vld [vmem:[%s2775_s3 + $0xa8] sm:$0xff] }
  0x3c   :  { %116 = vadd.xlane.f32.xlu0 %v115_v47 }
  0x43   :  { %128 = vadd.xlane.f32.xlu1 %v127_v51  ;;  %131 = vadd.xlane.f32.xlu2 %v130_v52  ;;  %v290_v51 = vsel %vm51_vm0, %v208_v45, 0.0  ;;  %v284_v52 = vsel %vm51_vm0, %v206_v48, 0.0 }
  0x44   :  { %125 = vadd.xlane.f32.xlu0 %v124_v53  ;;  %v1501_v53 = vmov 16.0  }
  0x45   :  { %1465 = vrcp.f32 %v1501_v53 }
  0x4b   :  { %137 = vadd.xlane.f32.xlu1 %v136_v57  ;;  %140 = vadd.xlane.f32.xlu2 %v139_v58  ;;  %v209_v58 = vld [vmem:[%s2775_s3 + $0xb0] sm:$0xff]  ;;  %v1466_v62 = vpop.eup %1465 }
  0x4c   :  { %134 = vadd.xlane.f32.xlu0 %v133_v59  ;;  %vm153_vm1 = vweird.f32 %v1466_v62 }
  0x53   :  { %146 = vadd.xlane.f32.xlu1 %v145_v63  ;;  %228 = vadd.xlane.f32.xlu2 %v227_v0  ;;  %v293_v63 = vsel %vm51_vm0, %v209_v58, 0.0  ;;  %v149_v0 = vmul.f32 16.0, %v1466_v62 }
  0x54   :  { %143 = vadd.xlane.f32.xlu0 %v142_v1  ;;  %v213_v1 = vld [vmem:[%s2775_s3 + $0xd0] sm:$0xff] }
  0x55   :  { %v305_v8 = vsel %vm51_vm0, %v213_v1, 0.0 }
  0x5b   :  { %234 = vadd.xlane.f32.xlu1 %v233_v5  ;;  %237 = vadd.xlane.f32.xlu2 %v236_v6  ;;  %v212_v5 = vld [vmem:[%s2775_s3 + $0xc8] sm:$0xff] }
  0x5c   :  { %231 = vadd.xlane.f32.xlu0 %v230_v7  ;;  %v150_v7 = vsub.f32 1.0, %v149_v0  ;;  %v302_v10 = vsel %vm51_vm0, %v212_v5, 0.0 }
  0x63   :  { %243 = vadd.xlane.f32.xlu1 %v242_v11  ;;  %246 = vadd.xlane.f32.xlu2 %v245_v12  ;;  %v151_v11 = vmul.f32 %v1466_v62, %v150_v7  ;;  %v216_v12 = vld [vmem:[%s2775_s3 + $0xe8] sm:$0xff] }
  0x64   :  { %240 = vadd.xlane.f32.xlu0 %v239_v13  ;;  %v217_v13 = vld [vmem:[%s2775_s3 + $0xf0] sm:$0xff] }
  0x65   :  { %v317_v20 = vsel %vm51_vm0, %v217_v13, 0.0 }
  0x6b   :  { %252 = vadd.xlane.f32.xlu1 %v251_v17  ;;  %255 = vadd.xlane.f32.xlu2 %v254_v18  ;;  %v152_v18 = vadd.f32 %v1466_v62, %v151_v11 }
  0x6c   :  { %249 = vadd.xlane.f32.xlu0 %v248_v19  ;;  %v314_v19 = vsel %vm51_vm0, %v216_v12, 0.0 }
  0x73   :  { %261 = vadd.xlane.f32.xlu1 %v260_v23  ;;  %264 = vadd.xlane.f32.xlu2 %v263_v24  ;;  %v1816_v23 = vsel %vm153_vm1, %v1466_v62, %v152_v18 }
  0x74   :  { %258 = vadd.xlane.f32.xlu0 %v257_v25  ;;  %v220_v25 = vld [vmem:[%s2775_s3 + $0x108] sm:$0xff] }
  0x75   :  { %v326_v36 = vsel %vm51_vm0, %v220_v25, 0.0 }
  0x76   :  { %v1716_v28 = vpop.xlane.xlu2 %65  ;;  %v1718_v29 = vpop.xlane.xlu1 %59 }
  0x77   :  { %v1723_v31 = vpop.xlane.xlu0 %53 }
  0x7b   :  { %270 = vadd.xlane.f32.xlu1 %v269_v32  ;;  %273 = vadd.xlane.f32.xlu2 %v272_v33  ;;  %v218_v32 = vld [vmem:[%s2775_s3 + $0xf8] sm:$0xff]  ;;  %v1836_v33 = vand.u32 127, %v2777_v22 }
  0x7c   :  { %267 = vadd.xlane.f32.xlu0 %v266_v34  ;;  %v1840_v34 = vmul.f32 %v1816_v23, %v1723_v31  ;;  %v1858_v31 = vmul.f32 %v1816_v23, %v1718_v29 }
  0x7d   :  { %v1878_v29 = vadd.s32 4294967280, %v1836_v33 }
  0x7e   :  { %v1734_v37 = vpop.xlane.xlu2 %68  ;;  %v1736_v38 = vpop.xlane.xlu1 %62  ;;  %2816 = vst [vmem:[#allocation7_spill] sm:$0xff] %v1840_v34  ;;  %v388_v45 = vmul.f32 %v1840_v34, %v1840_v34 }
  0x7f   :  { %v1741_v40 = vpop.xlane.xlu0 %56  ;;  %2818 = vst [vmem:[#allocation9_spill] sm:$0xff] %v1858_v31  ;;  %v1862_v44 = vmul.f32 %v1816_v23, %v1734_v37  ;;  %v1868_v48 = vmul.f32 %v1816_v23, %v1736_v38  ;;  %v1881_v37 = vadd.s32 4294967272, %v1836_v33 }
  0x80   :  { %v1820_v24 = vmul.f32 %v1816_v23, %v1741_v40  ;;  %v1847_v40 = vadd.s32 4294967288, %v1836_v33  ;;  %v454_v62 = vperm.slane %v388_v45, %v1836_v33  ;;  %v224_v45 = vld [vmem:[%s2775_s3 + $0x128] sm:$0xff] }
  0x81   :  { %2819 = vst [vmem:[#allocation10_spill] sm:$0xff] %v1862_v44  ;;  %v393_v53 = vmul.f32 %v1862_v44, %v1862_v44 }
  0x82   :  { %2815 = vst [vmem:[#allocation6_spill] sm:$0xff] %v1820_v24 }
  0x83   :  { %279 = vadd.xlane.f32.xlu1 %v278_v41  ;;  %282 = vadd.xlane.f32.xlu2 %v281_v42  ;;  %v389_v41 = vmul.f32 %v1820_v24, %v1820_v24  ;;  %v320_v42 = vsel %vm51_vm0, %v218_v32, 0.0  ;;  %2820 = vst [vmem:[#allocation11_spill] sm:$0xff] %v1868_v48  ;;  %v226_v32 = vld [vmem:[%s2775_s3 + $0x138] sm:$0xff] }
  0x84   :  { %276 = vadd.xlane.f32.xlu0 %v275_v43  ;;  %v1854_v43 = vmul.f32 %v1816_v23, %v1716_v28 }
  0x85   :  { %v456_v38 = vperm.slane %v389_v41, %v1847_v40 }
  0x86   :  { %v1752_v46 = vpop.xlane.xlu1 %74  ;;  %v1754_v47 = vpop.xlane.xlu2 %77  ;;  %2817 = vst [vmem:[#allocation8_spill] sm:$0xff] %v1854_v43 }
  0x87   :  { %v1759_v49 = vpop.xlane.xlu0 %71  ;;  %v1896_v54 = vmul.f32 %v1816_v23, %v1752_v46  ;;  %v1900_v55 = vmul.f32 %v1816_v23, %v1754_v47  ;;  %v391_v46 = vmul.f32 %v1868_v48, %v1868_v48  ;;  %v458_v7 = vsel %vm457_vm2, %v456_v38, %v454_v62 }
  0x89   :  { %2823 = vst [vmem:[#allocation14_spill] sm:$0xff] %v1896_v54  ;;  %v396_v11 = vmul.f32 %v1900_v55, %v1900_v55  ;;  %v464_v12 = vperm.slane %v391_v46, %v1881_v37 }
  0x8a   :  { %2824 = vst [vmem:[#allocation15_spill] sm:$0xff] %v1900_v55 }
  0x8b   :  { %288 = vadd.xlane.f32.xlu1 %v287_v50  ;;  %291 = vadd.xlane.f32.xlu2 %v290_v51  ;;  %v1872_v50 = vmul.f32 %v1816_v23, %v1759_v49  ;;  %v222_v49 = vld [vmem:[%s2775_s3 + $0x118] sm:$0xff]  ;;  %v223_v51 = vld [vmem:[%s2775_s3 + $0x120] sm:$0xff]  ;;  %v474_v41 = vperm.slane %v396_v11, %v1836_v33 }
  0x8c   :  { %285 = vadd.xlane.f32.xlu0 %v284_v52  ;;  %v390_v52 = vmul.f32 %v1858_v31, %v1858_v31  ;;  %v332_v2 = vsel %vm51_vm0, %v222_v49, 0.0  ;;  %v335_v5 = vsel %vm51_vm0, %v223_v51, 0.0 }
  0x8d   :  { %2821 = vst [vmem:[#allocation12_spill] sm:$0xff] %v1872_v50  ;;  %v394_v47 = vmul.f32 %v1872_v50, %v1872_v50 }
  0x8e   :  { %v1770_v56 = vpop.xlane.xlu1 %83  ;;  %v1772_v57 = vpop.xlane.xlu2 %86 }
  0x8f   :  { %v81_v59 = vpop.xlane.xlu0 %80  ;;  %v1918_v0 = vmul.f32 %v1816_v23, %v1770_v56  ;;  %v395_v56 = vmul.f32 %v1896_v54, %v1896_v54  ;;  %v470_v13 = vperm.slane %v394_v47, %v1878_v29  ;;  %v1936_v16 = vmul.f32 %v1816_v23, %v1772_v57 }
  0x90   :  { %v1875_v28 = vmul.f32 %v1816_v23, %v81_v59 }
  0x91   :  { %2825 = vst [vmem:[#allocation16_spill] sm:$0xff] %v1918_v0  ;;  %v1973_v51 = vmul.f32 %v1936_v16, %v1936_v16 }
  0x92   :  { %2822 = vst [vmem:[#allocation13_spill] sm:$0xff] %v1875_v28  ;;  %v397_v1 = vmul.f32 %v1875_v28, %v1875_v28 }
  0x93   :  { %297 = vadd.xlane.f32.xlu1 %v296_v60  ;;  %300 = vadd.xlane.f32.xlu2 %v299_v61  ;;  %v221_v60 = vld [vmem:[%s2775_s3 + $0x110] sm:$0xff]  ;;  %v392_v61 = vmul.f32 %v1854_v43, %v1854_v43  ;;  %2826 = vst [vmem:[#allocation17_spill] sm:$0xff] %v1936_v16 }
  0x94   :  { %294 = vadd.xlane.f32.xlu0 %v293_v63 }
  0x95   :  { %v467_v18 = vperm.slane %v392_v61, %v1836_v33  ;;  %v344_v61 = vsel %vm51_vm0, %v226_v32, 0.0 }
  0x96   :  { %v1786_v3 = vpop.xlane.xlu1 %92  ;;  %v1788_v4 = vpop.xlane.xlu2 %95 }
  0x97   :  { %v1793_v6 = vpop.xlane.xlu0 %89  ;;  %v1945_v25 = vmul.f32 %v1816_v23, %v1786_v3  ;;  %v1949_v57 = vmul.f32 %v1816_v23, %v1788_v4 }
  0x98   :  { %v1962_v3 = vmul.f32 %v1816_v23, %v1793_v6 }
  0x99   :  { %2827 = vst [vmem:[#allocation18_spill] sm:$0xff] %v1945_v25  ;;  %v401_v62 = vmul.f32 %v1945_v25, %v1945_v25  ;;  %v1983_v46 = vmul.f32 %v1949_v57, %v1949_v57 }
  0x9a   :  { %2828 = vst [vmem:[#allocation19_spill] sm:$0xff] %v1949_v57 }
  0x9b   :  { %306 = vadd.xlane.f32.xlu1 %v305_v8  ;;  %309 = vadd.xlane.f32.xlu2 %v308_v9  ;;  %v329_v8 = vsel %vm51_vm0, %v221_v60, 0.0  ;;  %v460_v9 = vperm.slane %v390_v52, %v1878_v29  ;;  %2829 = vst [vmem:[#allocation20_spill] sm:$0xff] %v1962_v3  ;;  %v341_v60 = vsel %vm51_vm0, %v225_v26, 0.0 }
  0x9c   :  { %303 = vadd.xlane.f32.xlu0 %v302_v10  ;;  %v468_v10 = vperm.slane %v393_v53, %v1847_v40 }
  0x9e   :  { %v1804_v14 = vpop.xlane.xlu1 %101  ;;  %v1806_v15 = vpop.xlane.xlu2 %104 }
  0x9f   :  { %v1811_v17 = vpop.xlane.xlu0 %98 }
  0xa3   :  { %315 = vadd.xlane.f32.xlu1 %v314_v19  ;;  %318 = vadd.xlane.f32.xlu2 %v317_v20  ;;  %v462_v19 = vsel %vm461_vm3, %v460_v9, %v458_v7  ;;  %v398_v20 = vmul.f32 %v1918_v0, %v1918_v0  ;;  %v1996_v7 = vmul.f32 %v1816_v23, %v1804_v14 }
  0xa4   :  { %312 = vadd.xlane.f32.xlu0 %v311_v21  ;;  %v475_v21 = vperm.slane %v397_v1, %v1847_v40  ;;  %v1968_v38 = vsel %vm465_vm4, %v464_v12, %v462_v19  ;;  %v338_v1 = vsel %vm51_vm0, %v224_v45, 0.0  ;;  %v2028_v12 = vmul.f32 %v1816_v23, %v1811_v17 }
  0xa5   :  { %v477_v53 = vperm.slane %v398_v20, %v1878_v29  ;;  %2831 = vst [vmem:[#allocation22_spill] sm:$0xff] %v1996_v7 }
  0xa6   :  { %v1828_v27 = vpop.xlane.xlu1 %110  ;;  %v1830_v30 = vpop.xlane.xlu2 %113  ;;  %v476_v6 = vsel %vm457_vm2, %v475_v21, %v474_v41  ;;  %2838 = vst [vmem:[#allocation29_spill] sm:$0xff] %v2028_v12 }
  0xa7   :  { %v1842_v35 = vpop.xlane.xlu0 %107  ;;  %v478_v14 = vsel %vm461_vm3, %v477_v53, %v476_v6  ;;  %v2039_v20 = vmul.f32 %v1816_v23, %v1828_v27 }
  0xa8   :  { %v2006_v9 = vmul.f32 %v1816_v23, %v1842_v35  ;;  %v482_v35 = vperm.slane %v401_v62, %v1847_v40 }
  0xa9   :  { %2839 = vst [vmem:[#allocation30_spill] sm:$0xff] %v2039_v20 }
  0xaa   :  { %2833 = vst [vmem:[#allocation24_spill] sm:$0xff] %v2006_v9  ;;  %v406_v17 = vmul.f32 %v2006_v9, %v2006_v9 }
  0xab   :  { %327 = vadd.xlane.f32.xlu2 %v326_v36  ;;  %324 = vadd.xlane.f32.xlu1 %v323_v39  ;;  %v469_v36 = vsel %vm457_vm2, %v468_v10, %v467_v18  ;;  %v472_v39 = vperm.slane %v395_v56, %v1881_v37  ;;  %v2010_v10 = vmul.f32 %v1816_v23, %v1830_v30 }
  0xac   :  { %321 = vadd.xlane.f32.xlu0 %v320_v42  ;;  %v471_v49 = vsel %vm461_vm3, %v470_v13, %v469_v36  ;;  %v484_v30 = vperm.slane %v1983_v46, %v1878_v29  ;;  %v404_v18 = vmul.f32 %v1996_v7, %v1996_v7  ;;  %v491_v62 = vperm.slane %v406_v17, %v1878_v29 }
  0xad   :  { %2834 = vst [vmem:[#allocation25_spill] sm:$0xff] %v2010_v10  ;;  %v408_v32 = vmul.f32 %v2010_v10, %v2010_v10 }
  0xae   :  { %v1902_v58 = vpop.xlane.xlu1 %119  ;;  %v1904_v59 = vpop.xlane.xlu2 %122  ;;  %v488_v6 = vperm.slane %v404_v18, %v1836_v33 }
  0xaf   :  { %v117_v63 = vpop.xlane.xlu0 %116  ;;  %v2015_v56 = vmul.f32 %v1816_v23, %v1902_v58  ;;  %v2047_v36 = vmul.f32 %v1816_v23, %v1904_v59  ;;  %v403_v59 = vmul.f32 %v2028_v12, %v2028_v12  ;;  %v495_v46 = vperm.slane %v408_v32, %v1836_v33 }
  0xb0   :  { %v1986_v47 = vmul.f32 %v1816_v23, %v117_v63  ;;  %v479_v63 = vperm.slane %v1973_v51, %v1881_v37 }
  0xb1   :  { %2835 = vst [vmem:[#allocation26_spill] sm:$0xff] %v2015_v56  ;;  %v410_v27 = vmul.f32 %v2015_v56, %v2015_v56 }
  0xb2   :  { %2830 = vst [vmem:[#allocation21_spill] sm:$0xff] %v1986_v47  ;;  %v409_v58 = vmul.f32 %v1986_v47, %v1986_v47  ;;  %v480_v32 = vsel %vm465_vm4, %v479_v63, %v478_v14 }
  0xb3   :  { %333 = vadd.xlane.f32.xlu1 %v332_v2  ;;  %336 = vadd.xlane.f32.xlu2 %v335_v5  ;;  %v1990_v2 = vsel %vm465_vm4, %v472_v39, %v471_v49  ;;  %v400_v5 = vmul.f32 %v1962_v3, %v1962_v3  ;;  %2840 = vst [vmem:[#allocation31_spill] sm:$0xff] %v2047_v36 }
  0xb4   :  { %330 = vadd.xlane.f32.xlu0 %v329_v8  ;;  %v2000_v8 = vmul.f32 %v1816_v23, %v1806_v15 }
  0xb5   :  { %v481_v13 = vperm.slane %v400_v5, %v1836_v33 }
  0xb6   :  { %v129_v4 = vpop.xlane.xlu1 %128  ;;  %v132_v42 = vpop.xlane.xlu2 %131  ;;  %2832 = vst [vmem:[#allocation23_spill] sm:$0xff] %v2000_v8  ;;  %v405_v19 = vmul.f32 %v2000_v8, %v2000_v8 }
  0xb7   :  { %v126_v52 = vpop.xlane.xlu0 %125  ;;  %v2018_v15 = vmul.f32 %v1816_v23, %v129_v4  ;;  %v2050_v39 = vmul.f32 %v1816_v23, %v132_v42  ;;  %v496_v42 = vperm.slane %v409_v58, %v1847_v40  ;;  %v483_v53 = vsel %vm457_vm2, %v482_v35, %v481_v13 }
  0xb8   :  { %v2021_v11 = vmul.f32 %v1816_v23, %v126_v52  ;;  %v498_v35 = vperm.slane %v410_v27, %v1878_v29 }
  0xb9   :  { %2836 = vst [vmem:[#allocation27_spill] sm:$0xff] %v2018_v15  ;;  %v413_v4 = vmul.f32 %v2018_v15, %v2018_v15  ;;  %v414_v5 = vmul.f32 %v2050_v39, %v2050_v39 }
  0xba   :  { %2837 = vst [vmem:[#allocation28_spill] sm:$0xff] %v2021_v11  ;;  %v412_v45 = vmul.f32 %v2021_v11, %v2021_v11 }
  0xbb   :  { %342 = vadd.xlane.f32.xlu1 %v341_v60  ;;  %345 = vadd.xlane.f32.xlu2 %v344_v61  ;;  %2841 = vst [vmem:[#allocation32_spill] sm:$0xff] %v2050_v39  ;;  %v489_v60 = vperm.slane %v405_v19, %v1847_v40  ;;  %v407_v61 = vmul.f32 %v2039_v20, %v2039_v20 }
  0xbc   :  { %339 = vadd.xlane.f32.xlu0 %v338_v1  ;;  %v411_v1 = vmul.f32 %v2047_v36, %v2047_v36  ;;  %v503_v58 = vperm.slane %v413_v4, %v1847_v40  ;;  %v502_v13 = vperm.slane %v412_v45, %v1836_v33  ;;  %v486_v19 = vperm.slane %v403_v59, %v1881_v37 }
  0xbd   :  { %v490_v27 = vsel %vm457_vm2, %v489_v60, %v488_v6  ;;  %v493_v4 = vperm.slane %v407_v61, %v1881_v37 }
  0xbe   :  { %v138_v21 = vpop.xlane.xlu1 %137  ;;  %v141_v26 = vpop.xlane.xlu2 %140  ;;  %v492_v59 = vsel %vm461_vm3, %v491_v62, %v490_v27  ;;  %v504_v63 = vsel %vm457_vm2, %v503_v58, %v502_v13 }
  0xbf   :  { %v135_v41 = vpop.xlane.xlu0 %134  ;;  %v2065_v51 = vmul.f32 %v1816_v23, %v138_v21  ;;  %v2068_v52 = vmul.f32 %v1816_v23, %v141_v26  ;;  %v497_v21 = vsel %vm457_vm2, %v496_v42, %v495_v46  ;;  %v500_v42 = vperm.slane %v411_v1, %v1881_v37 }
  0xc0   :  { %v2059_v49 = vmul.f32 %v1816_v23, %v135_v41  ;;  %v485_v41 = vsel %vm461_vm3, %v484_v30, %v483_v53  ;;  %v505_v46 = vperm.slane %v414_v5, %v1878_v29  ;;  %v499_v53 = vsel %vm461_vm3, %v498_v35, %v497_v21 }
  0xc1   :  { %2843 = vst [vmem:[#allocation34_spill] sm:$0xff] %v2065_v51  ;;  %v416_v26 = vmul.f32 %v2065_v51, %v2065_v51  ;;  %v417_v17 = vmul.f32 %v2068_v52, %v2068_v52  ;;  %v487_v6 = vsel %vm465_vm4, %v486_v19, %v485_v41  ;;  %v517_v1 = vsel %vm516_vm5, %v1990_v2, %v1968_v38 }
  0xc2   :  { %2842 = vst [vmem:[#allocation33_spill] sm:$0xff] %v2059_v49  ;;  %v415_v18 = vmul.f32 %v2059_v49, %v2059_v49  ;;  %v519_v35 = vsel %vm518_vm6, %v480_v32, %v517_v1  ;;  %v501_v13 = vsel %vm465_vm4, %v500_v42, %v499_v53 }
  0xc3   :  { %2844 = vst [vmem:[#allocation35_spill] sm:$0xff] %v2068_v52  ;;  %v509_v60 = vperm.slane %v416_v26, %v1836_v33  ;;  %v510_v61 = vperm.slane %v417_v17, %v1847_v40  ;;  %v521_v38 = vsel %vm520_vm7, %v487_v6, %v519_v35 }
  0xc4   :  { %v507_v14 = vperm.slane %v415_v18, %v1881_v37  ;;  %v506_v18 = vsel %vm461_vm3, %v505_v46, %v504_v63 }
  0xc5   :  { %v511_v2 = vsel %vm457_vm2, %v510_v61, %v509_v60 }
  0xc6   :  { %v147_v45 = vpop.xlane.xlu1 %146  ;;  %v229_v22 = vpop.xlane.xlu2 %228  ;;  %v508_v21 = vsel %vm465_vm4, %v507_v14, %v506_v18 }
  0xc7   :  { %v2100_v49 = vmul.f32 %v1816_v23, %v147_v45  ;;  %v144_v52 = vpop.xlane.xlu0 %143 }
  0xc8   :  { %v2105_v30 = vmul.f32 %v1816_v23, %v144_v52  ;;  %v494_v52 = vsel %vm465_vm4, %v493_v4, %v492_v59 }
  0xc9   :  { %2845 = vst [vmem:[#allocation36_spill] sm:$0xff] %v2100_v49  ;;  %v419_v62 = vmul.f32 %v2100_v49, %v2100_v49  ;;  %v523_v26 = vsel %vm522_vm8, %v494_v52, %v521_v38 }
  0xca   :  { %2846 = vst [vmem:[#allocation37_spill] sm:$0xff] %v2105_v30  ;;  %v418_v5 = vmul.f32 %v2105_v30, %v2105_v30  ;;  %v525_v27 = vsel %vm524_vm9, %v501_v13, %v523_v26 }
  0xcb   :  { %v514_v58 = vperm.slane %v419_v62, %v1881_v37  ;;  %v527_v59 = vsel %vm526_vm10, %v508_v21, %v525_v27 }
  0xcc   :  { %v512_v19 = vperm.slane %v418_v5, %v1878_v29 }
  0xce   :  { %v235_v17 = vpop.xlane.xlu1 %234  ;;  %v238_v32 = vpop.xlane.xlu2 %237  ;;  %v513_v41 = vsel %vm461_vm3, %v512_v19, %v511_v2 }
  0xcf   :  { %v232_v4 = vpop.xlane.xlu0 %231  ;;  %v515_v45 = vsel %vm465_vm4, %v514_v58, %v513_v41 }
  0xd0   :  { %v529_v42 = vsel %vm528_vm11, %v515_v45, %v527_v59  ;;  %v2137_v2 = vmul.f32 %v232_v4, %v1816_v23  ;;  %v2148_v45 = vmul.f32 %v229_v22, %v1816_v23  ;;  %v2151_v59 = vmul.f32 %v235_v17, %v1816_v23 }
  0xd1   :  { %v532_v46 = vsel %vm2814_vm12, %v529_v42, 0.0 }
  0xd2   :  { %533 = vadd.xlane.f32.xlu0 %v532_v46  ;;  %v549_v42 = vmul.f32 %v2137_v2, %v2137_v2  ;;  %v548_v49 = vmul.f32 %v2148_v45, %v2148_v45  ;;  %v550_v56 = vmul.f32 %v2151_v59, %v2151_v59 }
  0xd4   :  { %v628_v20 = vperm.slane %v548_v49, %v1836_v33 }
  0xd6   :  { %v244_v63 = vpop.xlane.xlu1 %243  ;;  %v247_v14 = vpop.xlane.xlu2 %246 }
  0xd7   :  { %v241_v53 = vpop.xlane.xlu0 %240  ;;  %v2142_v41 = vmul.f32 %v244_v63, %v1816_v23  ;;  %v2156_v4 = vmul.f32 %v247_v14, %v1816_v23  ;;  %v2174_v14 = vmul.f32 %v238_v32, %v1816_v23 }
  0xd8   :  { %v2145_v27 = vmul.f32 %v241_v53, %v1816_v23 }
  0xd9   :  { %v553_v46 = vmul.f32 %v2142_v41, %v2142_v41 }
  0xda   :  { %v552_v63 = vmul.f32 %v2145_v27, %v2145_v27 }
  0xdc   :  { %v635_v10 = vperm.slane %v552_v63, %v1836_v33  ;;  %v631_v63 = vperm.slane %v550_v56, %v1878_v29 }
  0xde   :  { %v253_v6 = vpop.xlane.xlu1 %252  ;;  %v256_v60 = vpop.xlane.xlu2 %255 }
  0xdf   :  { %v250_v61 = vpop.xlane.xlu0 %249  ;;  %v2163_v53 = vmul.f32 %v253_v6, %v1816_v23  ;;  %v2166_v22 = vmul.f32 %v256_v60, %v1816_v23  ;;  %v629_v6 = vperm.slane %v549_v42, %v1847_v40  ;;  %v554_v60 = vmul.f32 %v2156_v4, %v2156_v4 }
  0xe0   :  { %v2169_v17 = vmul.f32 %v250_v61, %v1816_v23  ;;  %v636_v61 = vperm.slane %v553_v46, %v1847_v40  ;;  %v2192_v42 = vmul.f32 %v2174_v14, %v2174_v14 }
  0xe1   :  { %v556_v15 = vmul.f32 %v2163_v53, %v2163_v53  ;;  %v557_v32 = vmul.f32 %v2166_v22, %v2166_v22  ;;  %v638_v9 = vperm.slane %v554_v60, %v1878_v29  ;;  %v630_v49 = vsel %vm457_vm2, %v629_v6, %v628_v20 }
  0xe2   :  { %v555_v8 = vmul.f32 %v2169_v17, %v2169_v17  ;;  %v637_v54 = vsel %vm457_vm2, %v636_v61, %v635_v10 }
  0xe3   :  { %v643_v16 = vperm.slane %v557_v32, %v1847_v40 }
  0xe6   :  { %v262_v62 = vpop.xlane.xlu1 %261  ;;  %v265_v1 = vpop.xlane.xlu2 %264 }
  0xe7   :  { %v259_v5 = vpop.xlane.xlu0 %258  ;;  %v2195_v57 = vmul.f32 %v262_v62, %v1816_v23  ;;  %v2206_v7 = vmul.f32 %v265_v1, %v1816_v23  ;;  %v642_v62 = vperm.slane %v556_v15, %v1836_v33  ;;  %v2225_v15 = vsel %vm461_vm3, %v631_v63, %v630_v49 }
  0xe8   :  { %v2203_v25 = vmul.f32 %v259_v5, %v1816_v23 }
  0xe9   :  { %v2220_v1 = vmul.f32 %v2195_v57, %v2195_v57  ;;  %v560_v60 = vmul.f32 %v2206_v7, %v2206_v7  ;;  %v644_v32 = vsel %vm457_vm2, %v643_v16, %v642_v62 }
  0xee   :  { %v271_v52 = vpop.xlane.xlu1 %270  ;;  %v274_v35 = vpop.xlane.xlu2 %273 }
  0xef   :  { %v268_v13 = vpop.xlane.xlu0 %267  ;;  %v2214_v56 = vmul.f32 %v271_v52, %v1816_v23  ;;  %v558_v52 = vmul.f32 %v2203_v25, %v2203_v25  ;;  %v2234_v5 = vmul.f32 %v274_v35, %v1816_v23  ;;  %v647_v35 = vperm.slane %v2220_v1, %v1881_v37 }
  0xf0   :  { %v2198_v46 = vmul.f32 %v268_v13, %v1816_v23  ;;  %v640_v13 = vperm.slane %v555_v8, %v1881_v37  ;;  %v639_v8 = vsel %vm461_vm3, %v638_v9, %v637_v54 }
  0xf1   :  { %2847 = vst [vmem:[#allocation38_spill] sm:$0xff] %v2234_v5  ;;  %v562_v9 = vmul.f32 %v2214_v56, %v2214_v56  ;;  %v563_v1 = vmul.f32 %v2234_v5, %v2234_v5 }
  0xf2   :  { %v561_v20 = vmul.f32 %v2198_v46, %v2198_v46  ;;  %v2243_v54 = vsel %vm465_vm4, %v640_v13, %v639_v8  ;;  %v645_v13 = vperm.slane %v558_v52, %v1878_v29 }
  0xf3   :  { %v652_v52 = vperm.slane %v562_v9, %v1878_v29  ;;  %v654_v34 = vperm.slane %v563_v1, %v1881_v37 }
  0xf6   :  { %v280_v58 = vpop.xlane.xlu1 %279  ;;  %v2134_v18 = vpop.xlane.xlu2 %282 }
  0xf7   :  { %v277_v19 = vpop.xlane.xlu0 %276  ;;  %v2237_v28 = vmul.f32 %v280_v58, %v1816_v23  ;;  %v650_v58 = vperm.slane %v561_v20, %v1847_v40 }
  0xf8   :  { %v2240_v63 = vmul.f32 %v277_v19, %v1816_v23  ;;  %v2258_v19 = vmul.f32 %v2134_v18, %v1816_v23 }
  0xf9   :  { %2848 = vst [vmem:[#allocation39_spill] sm:$0xff] %v2237_v28  ;;  %v565_v18 = vmul.f32 %v2237_v28, %v2237_v28 }
  0xfa   :  { %v566_v39 = vmul.f32 %v2258_v19, %v2258_v19 }
  0xfb   :  { %v657_v55 = vperm.slane %v565_v18, %v1847_v40 }
  0xfc   :  { %v659_v28 = vperm.slane %v566_v39, %v1878_v29 }
  0xfe   :  { %v289_v21 = vpop.xlane.xlu1 %288  ;;  %v292_v38 = vpop.xlane.xlu2 %291 }
  0xff   :  { %v2139_v26 = vpop.xlane.xlu0 %285  ;;  %v2248_v49 = vmul.f32 %v289_v21, %v1816_v23  ;;  %v2261_v62 = vmul.f32 %v292_v38, %v1816_v23  ;;  %v649_v21 = vperm.slane %v560_v60, %v1836_v33  ;;  %v564_v38 = vmul.f32 %v2240_v63, %v2240_v63 }
 0x101   :  { %v651_v3 = vsel %vm457_vm2, %v650_v58, %v649_v21 }
 0x106   :  { %v298_v30 = vpop.xlane.xlu1 %297  ;;  %v301_v36 = vpop.xlane.xlu2 %300 }
 0x107   :  { %v295_v51 = vpop.xlane.xlu0 %294  ;;  %v2295_v9 = vmul.f32 %v298_v30, %v1816_v23  ;;  %v656_v30 = vperm.slane %v564_v38, %v1836_v33 }
 0x108   :  { %v2266_v8 = vmul.f32 %v295_v51, %v1816_v23  ;;  %v568_v51 = vmul.f32 %v2248_v49, %v2248_v49 }
 0x109   :  { %v571_v38 = vmul.f32 %v2295_v9, %v2295_v9  ;;  %v658_v5 = vsel %vm457_vm2, %v657_v55, %v656_v30  ;;  %v2851_v55 = vperm.slane %v2192_v42, %v1881_v37 }
 0x10a   :  { %v663_v44 = vperm.slane %v568_v51, %v1836_v33  ;;  %v646_v51 = vsel %vm461_vm3, %v645_v13, %v644_v32 }
 0x10e   :  { %v307_v10 = vpop.xlane.xlu1 %306  ;;  %v310_v6 = vpop.xlane.xlu2 %309 }
 0x10f   :  { %v304_v61 = vpop.xlane.xlu0 %303  ;;  %v2278_v20 = vmul.f32 %v307_v10, %v1816_v23  ;;  %v569_v10 = vmul.f32 %v2261_v62, %v2261_v62  ;;  %v2302_v43 = vmul.f32 %v310_v6, %v1816_v23 }
 0x110   :  { %v2251_v16 = vmul.f32 %v304_v61, %v1816_v23  ;;  %v2269_v61 = vmul.f32 %v301_v36, %v1816_v23  ;;  %v2285_v36 = vmul.f32 %v2139_v26, %v1816_v23  ;;  %v570_v26 = vmul.f32 %v2266_v8, %v2266_v8 }
 0x111   :  { %v574_v47 = vmul.f32 %v2278_v20, %v2278_v20  ;;  %v664_v18 = vperm.slane %v569_v10, %v1847_v40  ;;  %v653_v10 = vsel %vm461_vm3, %v652_v52, %v651_v3 }
 0x112   :  { %2849 = vst [vmem:[#allocation40_spill] sm:$0xff] %v2269_v61  ;;  %v573_v60 = vmul.f32 %v2251_v16, %v2251_v16  ;;  %v572_v11 = vmul.f32 %v2269_v61, %v2269_v61  ;;  %v567_v6 = vmul.f32 %v2285_v36, %v2285_v36  ;;  %v666_v0 = vperm.slane %v570_v26, %v1878_v29 }
 0x113   :  { %v665_v13 = vsel %vm457_vm2, %v664_v18, %v663_v44  ;;  %v668_v26 = vperm.slane %v571_v38, %v1881_v37  ;;  %v655_v18 = vsel %vm465_vm4, %v654_v34, %v653_v10 }
 0x114   :  { %v671_v12 = vperm.slane %v573_v60, %v1847_v40  ;;  %v670_v60 = vperm.slane %v572_v11, %v1836_v33  ;;  %v661_v61 = vperm.slane %v567_v6, %v1881_v37  ;;  %v667_v30 = vsel %vm461_vm3, %v666_v0, %v665_v13 }
 0x116   :  { %v316_v50 = vpop.xlane.xlu1 %315  ;;  %v319_v48 = vpop.xlane.xlu2 %318  ;;  %v672_v32 = vsel %vm457_vm2, %v671_v12, %v670_v60  ;;  %v648_v12 = vsel %vm465_vm4, %v647_v35, %v646_v51  ;;  %v669_v51 = vsel %vm465_vm4, %v668_v26, %v667_v30 }
 0x117   :  { %v2305_v58 = vmul.f32 %v316_v50, %v1816_v23  ;;  %v313_v21 = vpop.xlane.xlu0 %312  ;;  %v2319_v50 = vmul.f32 %v319_v48, %v1816_v23  ;;  %v575_v48 = vmul.f32 %v2302_v43, %v2302_v43 }
 0x118   :  { %v2312_v24 = vmul.f32 %v313_v21, %v1816_v23 }
 0x119   :  { %2850 = vst [vmem:[#allocation41_spill] sm:$0xff] %v2305_v58  ;;  %v577_v31 = vmul.f32 %v2305_v58, %v2305_v58  ;;  %v673_v58 = vperm.slane %v574_v47, %v1878_v29  ;;  %v578_v11 = vmul.f32 %v2319_v50, %v2319_v50  ;;  %v634_v47 = vsel %vm465_vm4, %v2851_v55, %v2225_v15 }
 0x11a   :  { %v576_v21 = vmul.f32 %v2312_v24, %v2312_v24  ;;  %v675_v44 = vperm.slane %v575_v48, %v1881_v37  ;;  %v698_v42 = vsel %vm516_vm5, %v2243_v54, %v634_v47 }
 0x11b   :  { %v678_v3 = vperm.slane %v577_v31, %v1847_v40  ;;  %v660_v31 = vsel %vm461_vm3, %v659_v28, %v658_v5  ;;  %v680_v35 = vperm.slane %v578_v11, %v1878_v29  ;;  %v699_v28 = vsel %vm518_vm6, %v648_v12, %v698_v42 }
 0x11c   :  { %v677_v1 = vperm.slane %v576_v21, %v1836_v33  ;;  %v674_v21 = vsel %vm461_vm3, %v673_v58, %v672_v32  ;;  %v662_v15 = vsel %vm465_vm4, %v661_v61, %v660_v31  ;;  %v700_v58 = vsel %vm520_vm7, %v655_v18, %v699_v28 }
 0x11d   :  { %v676_v5 = vsel %vm465_vm4, %v675_v44, %v674_v21  ;;  %v701_v54 = vsel %vm522_vm8, %v662_v15, %v700_v58 }
 0x11e   :  { %v328_v39 = vpop.xlane.xlu2 %327  ;;  %v325_v52 = vpop.xlane.xlu1 %324  ;;  %v679_v34 = vsel %vm457_vm2, %v678_v3, %v677_v1  ;;  %v702_v48 = vsel %vm524_vm9, %v669_v51, %v701_v54 }
 0x11f   :  { %v322_v6 = vpop.xlane.xlu0 %321  ;;  %v681_v61 = vsel %vm461_vm3, %v680_v35, %v679_v34  ;;  %v703_v13 = vsel %vm526_vm10, %v676_v5, %v702_v48  ;;  %v2378_v26 = vmul.f32 %v328_v39, %v1816_v23  ;;  %v2381_v3 = vmul.f32 %v325_v52, %v1816_v23 }
 0x120   :  { %v2357_v38 = vmul.f32 %v322_v6, %v1816_v23 }
 0x121   :  { %v581_v30 = vmul.f32 %v2378_v26, %v2378_v26  ;;  %v580_v44 = vmul.f32 %v2381_v3, %v2381_v3 }
 0x122   :  { %v579_v0 = vmul.f32 %v2357_v38, %v2357_v38 }
 0x123   :  { %v685_v21 = vperm.slane %v581_v30, %v1847_v40  ;;  %v684_v42 = vperm.slane %v580_v44, %v1836_v33 }
 0x124   :  { %v682_v60 = vperm.slane %v579_v0, %v1881_v37 }
 0x125   :  { %v686_v48 = vsel %vm457_vm2, %v685_v21, %v684_v42  ;;  %v1502_v21 = vmov 0  }
 0x126   :  { %v334_v10 = vpop.xlane.xlu1 %333  ;;  %v337_v32 = vpop.xlane.xlu2 %336  ;;  %v683_v11 = vsel %vm465_vm4, %v682_v60, %v681_v61  ;;  %1383 = vset.pattern.permute.xlu0 %v1502_v21  ;;  %1382 = vset.pattern.permute.xlu1 %v1502_v21 }
 0x127   :  { %v331_v1 = vpop.xlane.xlu0 %330  ;;  %v704_v55 = vsel %vm528_vm11, %v683_v11, %v703_v13  ;;  %v2393_v39 = vmul.f32 %v334_v10, %v1816_v23  ;;  %v2396_v52 = vmul.f32 %v337_v32, %v1816_v23  ;;  %1381 = vset.pattern.permute.xlu2 %v1502_v21 }
 0x128   :  { %v708_v47 = vsel %vm2814_vm12, %v704_v55, 0.0  ;;  %v2386_v12 = vmul.f32 %v331_v1, %v1816_v23 }
 0x129   :  { %709 = vadd.xlane.f32.xlu1 %v708_v47  ;;  %v583_v51 = vmul.f32 %v2393_v39, %v2393_v39  ;;  %v584_v34 = vmul.f32 %v2396_v52, %v2396_v52 }
 0x12a   :  { %v582_v6 = vmul.f32 %v2386_v12, %v2386_v12 }
 0x12b   :  { %v689_v10 = vperm.slane %v583_v51, %v1881_v37 }
 0x12c   :  { %v687_v5 = vperm.slane %v582_v6, %v1878_v29 }
 0x12e   :  { %v343_v18 = vpop.xlane.xlu1 %342  ;;  %v346_v31 = vpop.xlane.xlu2 %345  ;;  %v688_v13 = vsel %vm461_vm3, %v687_v5, %v686_v48 }
 0x12f   :  { %v340_v15 = vpop.xlane.xlu0 %339  ;;  %v2403_v35 = vmul.f32 %v343_v18, %v1816_v23  ;;  %v2406_v0 = vmul.f32 %v346_v31, %v1816_v23  ;;  %v690_v47 = vsel %vm465_vm4, %v689_v10, %v688_v13 }
 0x130   :  { %v2413_v28 = vmul.f32 %v340_v15, %v1816_v23  ;;  %v691_v23 = vperm.slane %v584_v34, %v1836_v33 }
 0x131   :  { %v586_v58 = vmul.f32 %v2403_v35, %v2403_v35  ;;  %v587_v60 = vmul.f32 %v2406_v0, %v2406_v0 }
 0x132   :  { %v585_v54 = vmul.f32 %v2413_v28, %v2413_v28 }
 0x133   :  { %v694_v61 = vperm.slane %v586_v58, %v1878_v29  ;;  %v696_v11 = vperm.slane %v587_v60, %v1881_v37 }
 0x134   :  { %v692_v32 = vperm.slane %v585_v54, %v1847_v40 }
 0x136   :  { %v693_v1 = vsel %vm457_vm2, %v692_v32, %v691_v23 }
 0x137   :  { %v695_v55 = vsel %vm461_vm3, %v694_v61, %v693_v1 }
 0x138   :  { %v697_v30 = vsel %vm465_vm4, %v696_v11, %v695_v55 }
 0x139   :  { %v705_v44 = vsel %vm516_vm5, %v697_v30, %v690_v47 }
 0x13a   :  { %v712_v6 = vsel %vm711_vm13, %v705_v44, 0.0 }
 0x13b   :  { %713 = vadd.xlane.f32.xlu2 %v712_v6 }
 0x19c   :  { %v710_v18 = vpop.xlane.xlu1 %709 }
 0x19d   :  { %v715_v31 = vmax.f32 %v710_v18, 1e-24 }
 0x19f   :  { %1467 = vrsqrt.f32 %v715_v31  ;;  %vm723_vm0 = vweird.f32 %v715_v31 }
 0x1a5   :  { %v1468_v42 = vpop.eup %1467 }
 0x1a6   :  { %v718_v15 = vmul.f32 %v1468_v42, %v715_v31  ;;  %vm724_vm14 = vweird.f32 %v1468_v42 }
 0x1a7   :  { %vm725_vm1 = vmor %vm723_vm0, %vm724_vm14  ;;  %vm1098_vm0 = vcmask 1041408  }
 0x1a8   :  { %v719_v5 = vmul.f32 %v1468_v42, %v718_v15 }
 0x1aa   :  { %v720_v58 = vmul.f32 0.5, %v719_v5 }
 0x1ac   :  { %v721_v61 = vsub.f32 1.5, %v720_v58 }
 0x1ae   :  { %v714_v51 = vpop.xlane.xlu2 %713  ;;  %v722_v23 = vmul.f32 %v1468_v42, %v721_v61 }
 0x1af   :  { %v716_v34 = vmax.f32 %v714_v51, 1e-24 }
 0x1b0   :  { %v726_v13 = vsel %vm725_vm1, %v1468_v42, %v722_v23  ;;  %v534_v42 = vpop.xlane.xlu0 %533 }
 0x1b1   :  { %1469 = vrsqrt.f32 %v716_v34  ;;  %vm733_vm13 = vweird.f32 %v716_v34  ;;  %v788_v18 = vperm.slane %v726_v13, 0  ;;  %v790_v61 = vperm.slane %v726_v13, 2 }
 0x1b3   :  { %v808_v31 = vmul.f32 %v788_v18, %v2148_v45  ;;  %v809_v21 = vmul.f32 %v788_v18, %v2137_v2  ;;  %v810_v5 = vmul.f32 %v788_v18, %v2151_v59  ;;  %v816_v59 = vmul.f32 %v790_v61, %v2163_v53 }
 0x1b5   :  { %v1384_v15 = vpack.i.bf16 %v809_v21, %v808_v31  ;;  %v795_v21 = vperm.slane %v726_v13, 7 }
 0x1b7   :  { %v1470_v60 = vpop.eup %1469 }
 0x1b8   :  { %v728_v54 = vmul.f32 %v1470_v60, %v716_v34  ;;  %vm734_vm15 = vweird.f32 %v1470_v60  ;;  %v2450_v34 = vperm.slane %v726_v13, 4 }
 0x1b9   :  { %vm735_vm12 = vmor %vm733_vm13, %vm734_vm15  ;;  %vm1094_vm13 = vcmask 80896  }
 0x1ba   :  { %v729_v48 = vmul.f32 %v1470_v60, %v728_v54  ;;  %v824_v2 = vmul.f32 %v2450_v34, %v2240_v63  ;;  %v793_v54 = vperm.slane %v726_v13, 5 }
 0x1bc   :  { %v730_v10 = vmul.f32 0.5, %v729_v48  ;;  %v789_v48 = vperm.slane %v726_v13, 1  ;;  %v829_v63 = vmul.f32 %v793_v54, %v2261_v62 }
 0x1be   :  { %v731_v32 = vsub.f32 1.5, %v730_v10  ;;  %v812_v23 = vmul.f32 %v789_v48, %v2145_v27 }
 0x1c0   :  { %v732_v11 = vmul.f32 %v1470_v60, %v731_v32  ;;  %v813_v32 = vmul.f32 %v789_v48, %v2142_v41  ;;  %v814_v41 = vmul.f32 %v789_v48, %v2156_v4 }
 0x1c2   :  { %v736_v1 = vsel %vm735_vm12, %v1470_v60, %v732_v11 }
 0x1c3   :  { %v2434_v55 = vperm.slane %v736_v1, 0  ;;  %v2436_v47 = vperm.slane %v736_v1, 1  ;;  %v794_v1 = vperm.slane %v726_v13, 6 }
 0x1c5   :  { %v844_v30 = vmul.f32 %v2436_v47, %v2396_v52  ;;  %v841_v44 = vmul.f32 %v2434_v55, %v2378_v26  ;;  %v840_v6 = vmul.f32 %v2434_v55, %v2381_v3  ;;  %v846_v51 = vmul.f32 %v2436_v47, %v2403_v35 }
 0x1c6   :  { %v2448_v52 = vperm.slane %v726_v13, 3  ;;  %v845_v26 = vmul.f32 %v2436_v47, %v2413_v28  ;;  %v535_v3 = vmax.f32 %v534_v42, 1e-24  ;;  %v811_v35 = vmul.f32 %v788_v18, %v2174_v14 }
 0x1c7   :  { %1004 = vperm.xlu0 %1383, %v844_v30   ;;  %995 = vperm.xlu1 %1382, %v841_v44   ;;  %v842_v28 = vmul.f32 %v2434_v55, %v2386_v12  ;;  %v817_v14 = vmul.f32 %v790_v61, %v2166_v22  ;;  %v1394_v44 = vpack.i.bf16 %v813_v32, %v812_v23 }
 0x1c8   :  { %992 = vperm.xlu2 %1381, %v840_v6   ;;  %v822_v45 = vmul.f32 %v2448_v52, %v2214_v56  ;;  %1471 = vrsqrt.f32 %v535_v3  ;;  %v1389_v60 = vpack.i.bf16 %v811_v35, %v810_v5  ;;  %v827_v56 = vmul.f32 %v2450_v34, %v2285_v36  ;;  %v2854_v35 = vld [vmem:[#allocation39_spill] sm:$0xff] }
 0x1c9   :  { %v1404_v12 = vpack.i.bf16 %v817_v14, %v816_v59  ;;  %v831_v36 = vmul.f32 %v793_v54, %v2295_v9  ;;  %v833_v62 = vmul.f32 %v794_v1, %v2251_v16  ;;  %v820_v53 = vmul.f32 %v2448_v52, %v2206_v7 }
 0x1ca   :  { %v1419_v58 = vpack.i.bf16 %v824_v2, %v822_v45  ;;  %v1434_v11 = vpack.i.bf16 %v827_v56, %v829_v63  ;;  %v821_v27 = vmul.f32 %v2448_v52, %v2198_v46  ;;  %v815_v6 = vmul.f32 %v789_v48, %v2169_v17  ;;  %v2855_v48 = vld [vmem:[#allocation41_spill] sm:$0xff] }
 0x1cb   :  { %v1444_v18 = vpack.i.bf16 %v831_v36, %v833_v62  ;;  %v834_v16 = vmul.f32 %v794_v1, %v2278_v20  ;;  %v836_v7 = vmul.f32 %v795_v21, %v2312_v24  ;;  %v826_v46 = vmul.f32 %v2450_v34, %v2258_v19  ;;  %v2852_v19 = vld [vmem:[#allocation40_spill] sm:$0xff]  ;;  %v2861_v36 = vld [vmem:[#allocation6_spill] sm:$0xff]  ;;  %v2862_v62 = vld [vmem:[#allocation21_spill] sm:$0xff] }
 0x1cc   :  { %v1414_v31 = vpack.i.bf16 %v821_v27, %v820_v53  ;;  %v828_v9 = vmul.f32 %v793_v54, %v2248_v49  ;;  %v818_v17 = vmul.f32 %v790_v61, %v2203_v25  ;;  %vm542_vm14 = vweird.f32 %v535_v3  ;;  %v2863_v27 = vld [vmem:[#allocation15_spill] sm:$0xff] }
 0x1cd   :  { %v1449_v13 = vpack.i.bf16 %v836_v7, %v834_v16  ;;  %v830_v24 = vmul.f32 %v793_v54, %v2266_v8  ;;  %v832_v20 = vmul.f32 %v794_v1, %v2852_v19  ;;  %v546_v25 = vstv %s2772_s0  ;;  %v2867_v16 = vld [vmem:[#allocation12_spill] sm:$0xff]  ;;  %v2872_v19 = vld [vmem:[#allocation14_spill] sm:$0xff] }
 0x1ce   :  { %v1472_v10 = vpop.eup %1471  ;;  %v837_v56 = vmul.f32 %v795_v21, %v2855_v48  ;;  %v839_v14 = vmul.f32 %v795_v21, %v2357_v38  ;;  %v2876_v48 = vld [vmem:[#allocation19_spill] sm:$0xff] }
 0x1cf   :  { %1385 = vperm.xlu0 %1383, %v1384_v15   ;;  %1010 = vperm.xlu1 %1382, %v846_v51   ;;  %v537_v30 = vmul.f32 %v1472_v10, %v535_v3  ;;  %v1399_v15 = vpack.i.bf16 %v815_v6, %v814_v41  ;;  %v819_v51 = vmul.f32 %v790_v61, %v2195_v57  ;;  %vm543_vm12 = vweird.f32 %v1472_v10  ;;  %v2853_v57 = vld [vmem:[#allocation38_spill] sm:$0xff]  ;;  %v2864_v41 = vld [vmem:[#allocation8_spill] sm:$0xff] }
 0x1d0   :  { %1007 = vperm.xlu2 %1381, %v845_v26   ;;  %v1429_v26 = vpack.i.bf16 %v828_v9, %v826_v46  ;;  %vm544_vm15 = vmor %vm542_vm14, %vm543_vm12  ;;  %v823_v5 = vmul.f32 %v2448_v52, %v2853_v57  ;;  %v847_v3 = vmul.f32 %v2436_v47, %v2406_v0  ;;  %v1439_v61 = vpack.i.bf16 %v832_v20, %v830_v24  ;;  %v2868_v9 = vld [vmem:[#allocation32_spill] sm:$0xff]  ;;  %v2873_v57 = vld [vmem:[#allocation22_spill] sm:$0xff] }
 0x1d1   :  { %v538_v22 = vmul.f32 %v1472_v10, %v537_v30  ;;  %v1409_v2 = vpack.i.bf16 %v819_v51, %v818_v17  ;;  %v843_v52 = vmul.f32 %v2434_v55, %v2393_v39  ;;  %v838_v47 = vmul.f32 %v795_v21, %v2319_v50  ;;  %v2860_v30 = vld [vmem:[#allocation10_spill] sm:$0xff]  ;;  %v2869_v17 = vld [vmem:[#allocation20_spill] sm:$0xff] }
 0x1d2   :  { %vm1122_vm12 = vcmask 258048  }
 0x1d3   :  { %v539_v42 = vmul.f32 0.5, %v538_v22 }
 0x1d5   :  { %v540_v4 = vsub.f32 1.5, %v539_v42  ;;  %v2866_v42 = vld [vmem:[#allocation11_spill] sm:$0xff] }
 0x1d7   :  { %1420 = vperm.xlu0 %1383, %v1419_v58   ;;  %1390 = vperm.xlu1 %1382, %v1389_v60   ;;  %v541_v45 = vmul.f32 %v1472_v10, %v540_v4  ;;  %v825_v58 = vmul.f32 %v2450_v34, %v2854_v35  ;;  %v2856_v34 = vld [vmem:[#allocation7_spill] sm:$0xff]  ;;  %v2874_v35 = vld [vmem:[#allocation18_spill] sm:$0xff] }
 0x1d8   :  { %998 = vperm.xlu2 %1381, %v842_v28   ;;  %v835_v28 = vmul.f32 %v794_v1, %v2302_v43  ;;  %v2858_v43 = vld [vmem:[#allocation9_spill] sm:$0xff] }
 0x1d9   :  { %v545_v49 = vsel %vm544_vm15, %v1472_v10, %v541_v45  ;;  %v1424_v8 = vpack.i.bf16 %v823_v5, %v825_v58  ;;  %v2857_v10 = vld [vmem:[#allocation16_spill] sm:$0xff]  ;;  %vm2889_vm15 = vcmask 261120  }
 0x1da   :  { %v2493_v60 = vmul.f32 %v546_v25, %v545_v49  ;;  %v1454_v59 = vpack.i.bf16 %v835_v28, %v837_v56 }
 0x1dc   :  { %v738_v54 = vperm.slane %v2493_v60, 0  ;;  %v740_v0 = vperm.slane %v2493_v60, 2  ;;  %v741_v39 = vperm.slane %v2493_v60, 3  ;;  %v739_v55 = vperm.slane %v2493_v60, 1 }
 0x1dd   :  { %v2514_v38 = vperm.slane %v2493_v60, 5  ;;  %v742_v25 = vperm.slane %v2493_v60, 4 }
 0x1de   :  { %v754_v63 = vmul.f32 %v738_v54, %v2856_v34  ;;  %v764_v23 = vmul.f32 %v740_v0, %v2857_v10  ;;  %v756_v32 = vmul.f32 %v738_v54, %v2858_v43  ;;  %v755_v50 = vmul.f32 %v738_v54, %v2861_v36  ;;  %v2881_v36 = vld [vmem:[#allocation34_spill] sm:$0xff] }
 0x1df   :  { %1435 = vperm.xlu0 %1383, %v1434_v11   ;;  %1405 = vperm.xlu1 %1382, %v1404_v12   ;;  %v1459_v11 = vpack.i.bf16 %v839_v14, %v838_v47  ;;  %v2859_v12 = vld [vmem:[#allocation29_spill] sm:$0xff]  ;;  %v775_v53 = vmul.f32 %v2514_v38, %v2862_v62  ;;  %v762_v22 = vmul.f32 %v740_v0, %v2863_v27  ;;  %v2878_v47 = vld [vmem:[#allocation23_spill] sm:$0xff]  ;;  %v2882_v27 = vld [vmem:[#allocation26_spill] sm:$0xff] }
 0x1e0   :  { %1395 = vperm.xlu2 %1381, %v1394_v44   ;;  %v769_v1 = vmul.f32 %v741_v39, %v2859_v12  ;;  %v759_v44 = vmul.f32 %v739_v55, %v2860_v30  ;;  %v758_v6 = vmul.f32 %v739_v55, %v2864_v41  ;;  %v760_v7 = vmul.f32 %v739_v55, %v2867_v16 }
 0x1e1   :  { %v766_v51 = vmul.f32 %v741_v39, %v2869_v17  ;;  %v761_v20 = vmul.f32 %v739_v55, %v2872_v19  ;;  %v770_v5 = vmul.f32 %v742_v25, %v2873_v57  ;;  %v767_v58 = vmul.f32 %v741_v39, %v2874_v35  ;;  %v2886_v19 = vld [vmem:[#allocation36_spill] sm:$0xff] }
 0x1e2   :  { %v768_v56 = vmul.f32 %v741_v39, %v2876_v48  ;;  %v771_v14 = vmul.f32 %v742_v25, %v2878_v47  ;;  %v2880_v39 = vld [vmem:[#allocation25_spill] sm:$0xff]  ;;  %v745_v30 = vperm.slane %v2493_v60, 7 }
 0x1e3   :  { %v774_v55 = vmul.f32 %v2514_v38, %v2880_v39 }
 0x1e7   :  { %1445 = vperm.xlu0 %1383, %v1444_v18   ;;  %1415 = vperm.xlu1 %1382, %v1414_v31   ;;  %v2521_v18 = vperm.slane %v2493_v60, 6  ;;  %v2865_v31 = vld [vmem:[#allocation28_spill] sm:$0xff]  ;;  %v2883_v60 = vld [vmem:[#allocation31_spill] sm:$0xff] }
 0x1e8   :  { %1400 = vperm.xlu2 %1381, %v1399_v15   ;;  %v757_v15 = vmul.f32 %v738_v54, %v2866_v42  ;;  %v2875_v54 = vld [vmem:[#allocation24_spill] sm:$0xff] }
 0x1e9   :  { %v778_v21 = vmul.f32 %v2521_v18, %v2865_v31  ;;  %v780_v4 = vmul.f32 %v2521_v18, %v2868_v9  ;;  %v772_v28 = vmul.f32 %v742_v25, %v2875_v54  ;;  %v777_v9 = vmul.f32 %v2514_v38, %v2883_v60 }
 0x1ef   :  { %1450 = vperm.xlu0 %1383, %v1449_v13   ;;  %1430 = vperm.xlu1 %1382, %v1429_v26   ;;  %v2870_v13 = vld [vmem:[#allocation13_spill] sm:$0xff] }
 0x1f0   :  { %1410 = vperm.xlu2 %1381, %v1409_v2   ;;  %v763_v26 = vmul.f32 %v740_v0, %v2870_v13  ;;  %v2871_v2 = vld [vmem:[#allocation17_spill] sm:$0xff] }
 0x1f1   :  { %v765_v24 = vmul.f32 %v740_v0, %v2871_v2  ;;  %v2885_v2 = vld [vmem:[#allocation35_spill] sm:$0xff] }
 0x1f7   :  { %1013 = vperm.xlu0 %1383, %v847_v3   ;;  %1440 = vperm.xlu1 %1382, %v1439_v61  }
 0x1f8   :  { %1425 = vperm.xlu2 %1381, %v1424_v8  }
 0x1ff   :  { %1001 = vperm.xlu1 %1382, %v843_v52   ;;  %1171 = vperm.xlu0 %1383, %v754_v63  }
 0x200   :  { %1455 = vperm.xlu2 %1381, %v1454_v59   ;;  %v2877_v59 = vld [vmem:[#allocation30_spill] sm:$0xff] }
 0x201   :  { %v773_v0 = vmul.f32 %v742_v25, %v2877_v59 }
 0x207   :  { %1201 = vperm.xlu1 %1382, %v764_v23   ;;  %1177 = vperm.xlu0 %1383, %v756_v32   ;;  %v2879_v32 = vld [vmem:[#allocation27_spill] sm:$0xff] }
 0x208   :  { %1460 = vperm.xlu2 %1381, %v1459_v11   ;;  %v779_v11 = vmul.f32 %v2521_v18, %v2879_v32 }
 0x20f   :  { %1216 = vperm.xlu1 %1382, %v769_v1   ;;  %1186 = vperm.xlu0 %1383, %v759_v44  }
 0x210   :  { %1174 = vperm.xlu2 %1381, %v755_v50   ;;  %v782_v50 = vmul.f32 %v745_v30, %v2881_v36 }
 0x217   :  { %1234 = vperm.xlu1 %1382, %v775_v53   ;;  %1195 = vperm.xlu0 %1383, %v762_v22   ;;  %v776_v22 = vmul.f32 %v2514_v38, %v2882_v27 }
 0x218   :  { %1183 = vperm.xlu2 %1381, %v758_v6  }
 0x21f   :  { %1243 = vperm.xlu1 %1382, %v778_v21   ;;  %1180 = vperm.xlu0 %1383, %v757_v15  }
 0x220   :  { %1189 = vperm.xlu2 %1381, %v760_v7  }
 0x222   :  { %v2527_v46 = vpop.permute.xlu2 %992 }
 0x223   :  { %v1071_v38 = vperm.slane %v2527_v46, %v1836_v33 }
 0x227   :  { %1249 = vperm.xlu1 %1382, %v780_v4   ;;  %1207 = vperm.xlu0 %1383, %v766_v51   ;;  %v2884_v4 = vld [vmem:[#allocation37_spill] sm:$0xff] }
 0x228   :  { %1198 = vperm.xlu2 %1381, %v763_v26   ;;  %v784_v17 = vmul.f32 %v745_v30, %v2884_v4 }
 0x22a   :  { %v2533_v45 = vpop.permute.xlu2 %1007 }
 0x22f   :  { %1204 = vperm.xlu0 %1383, %v765_v24   ;;  %v783_v24 = vmul.f32 %v745_v30, %v2885_v2 }
 0x230   :  { %1192 = vperm.xlu2 %1381, %v761_v20   ;;  %v2579_v20 = vmul.f32 %v745_v30, %v2886_v19 }
 0x232   :  { %v2538_v49 = vpop.permute.xlu2 %998 }
 0x237   :  { %1219 = vperm.xlu0 %1383, %v770_v5  }
 0x238   :  { %1210 = vperm.xlu2 %1381, %v767_v58   ;;  %v1079_v58 = vperm.slane %v2533_v45, %v1847_v40 }
 0x239   :  { %v2542_v3 = vpop.permute.xlu1 %995  ;;  %v2544_v61 = vpop.permute.xlu0 %1004 }
 0x23a   :  { %v1396_v8 = vpop.permute.xlu2 %1395  ;;  %v1072_v59 = vperm.slane %v2542_v3, %v1847_v40  ;;  %v1078_v46 = vperm.slane %v2544_v61, %v1836_v33 }
 0x23b   :  { %v1398_v62 = vunpack.i.h.bf16 %v1396_v8  ;;  %v1397_v53 = vunpack.i.l.bf16 %v1396_v8 }
 0x23d   :  { %v1023_v51 = vperm.slane %v1398_v62, %v1847_v40  ;;  %v1022_v13 = vperm.slane %v1397_v53, %v1836_v33 }
 0x23f   :  { %1225 = vperm.xlu0 %1383, %v772_v28   ;;  %v1024_v47 = vsel %vm457_vm2, %v1023_v51, %v1022_v13 }
 0x240   :  { %1213 = vperm.xlu2 %1381, %v768_v56  }
 0x241   :  { %v2548_v52 = vpop.permute.xlu1 %1010  ;;  %v1386_v34 = vpop.permute.xlu0 %1385 }
 0x242   :  { %v1401_v63 = vpop.permute.xlu2 %1400  ;;  %v1388_v41 = vunpack.i.h.bf16 %v1386_v34  ;;  %v1387_v6 = vunpack.i.l.bf16 %v1386_v34 }
 0x243   :  { %v1402_v31 = vunpack.i.l.bf16 %v1401_v63  ;;  %v1403_v25 = vunpack.i.h.bf16 %v1401_v63  ;;  %v1074_v63 = vperm.slane %v2538_v49, %v1878_v29 }
 0x244   :  { %v1016_v57 = vperm.slane %v1388_v41, %v1847_v40  ;;  %v1015_v5 = vperm.slane %v1387_v6, %v1836_v33 }
 0x245   :  { %v1025_v8 = vperm.slane %v1402_v31, %v1878_v29  ;;  %v2616_v31 = vsel %vm457_vm2, %v1072_v59, %v1071_v38 }
 0x246   :  { %v1075_v61 = vsel %vm461_vm3, %v1074_v63, %v2616_v31 }
 0x247   :  { %1228 = vperm.xlu0 %1383, %v773_v0  }
 0x248   :  { %1222 = vperm.xlu2 %1381, %v771_v14   ;;  %v1027_v14 = vperm.slane %v1403_v25, %v1881_v37 }
 0x249   :  { %v1391_v10 = vpop.permute.xlu1 %1390  ;;  %v2552_v23 = vpop.permute.xlu0 %1420 }
 0x24a   :  { %v2554_v43 = vpop.permute.xlu2 %1410  ;;  %v1392_v21 = vunpack.i.l.bf16 %v1391_v10  ;;  %v1393_v35 = vunpack.i.h.bf16 %v1391_v10  ;;  %v1017_v10 = vsel %vm457_vm2, %v1016_v57, %v1015_v5 }
 0x24b   :  { %v1412_v0 = vunpack.i.l.bf16 %v2554_v43  ;;  %v1413_v3 = vunpack.i.h.bf16 %v2554_v43 }
 0x24c   :  { %v1018_v54 = vperm.slane %v1392_v21, %v1878_v29  ;;  %v1020_v32 = vperm.slane %v1393_v35, %v1881_v37  ;;  %v1081_v21 = vperm.slane %v2548_v52, %v1878_v29 }
 0x24d   :  { %v1032_v27 = vperm.slane %v1412_v0, %v1878_v29  ;;  %v1034_v4 = vperm.slane %v1413_v3, %v1881_v37 }
 0x24e   :  { %v1019_v39 = vsel %vm461_vm3, %v1018_v54, %v1017_v10 }
 0x24f   :  { %1246 = vperm.xlu0 %1383, %v779_v11   ;;  %v1026_v11 = vsel %vm461_vm3, %v1025_v8, %v1024_v47 }
 0x250   :  { %1231 = vperm.xlu2 %1381, %v774_v55   ;;  %v1423_v55 = vunpack.i.h.bf16 %v2552_v23 }
 0x251   :  { %v1406_v12 = vpop.permute.xlu1 %1405  ;;  %v2560_v1 = vpop.permute.xlu0 %1435 }
 0x252   :  { %v2563_v44 = vpop.permute.xlu2 %1425  ;;  %v1408_v42 = vunpack.i.h.bf16 %v1406_v12  ;;  %v1407_v15 = vunpack.i.l.bf16 %v1406_v12  ;;  %v1438_v41 = vunpack.i.h.bf16 %v2560_v1  ;;  %v1043_v60 = vperm.slane %v1423_v55, %v1836_v33 }
 0x253   :  { %v1427_v30 = vunpack.i.l.bf16 %v2563_v44 }
 0x254   :  { %v1030_v28 = vperm.slane %v1408_v42, %v1847_v40  ;;  %v1029_v48 = vperm.slane %v1407_v15, %v1836_v33  ;;  %v1021_v42 = vsel %vm465_vm4, %v1020_v32, %v1019_v39  ;;  %v1437_v15 = vunpack.i.l.bf16 %v2560_v1 }
 0x255   :  { %v1048_v1 = vperm.slane %v1438_v41, %v1881_v37 }
 0x256   :  { %v1031_v12 = vsel %vm457_vm2, %v1030_v28, %v1029_v48  ;;  %v1051_v5 = vperm.slane %v1437_v15, %v1847_v40 }
 0x257   :  { %1255 = vperm.xlu0 %1383, %v782_v50  }
 0x258   :  { %1237 = vperm.xlu2 %1381, %v776_v22   ;;  %v1422_v22 = vunpack.i.l.bf16 %v2552_v23  ;;  %v1033_v23 = vsel %vm461_vm3, %v1032_v27, %v1031_v12 }
 0x259   :  { %v1416_v16 = vpop.permute.xlu1 %1415  ;;  %v2568_v7 = vpop.permute.xlu0 %1445  ;;  %v1035_v57 = vsel %vm465_vm4, %v1034_v4, %v1033_v23  ;;  %v1464_v4 = vld [vmem:[%s2773_s1] ss:$0 sm:$0xff]  ;;  %s1504_s1 = smov [#allocation3]  }
 0x25a   :  { %v2575_v26 = vpop.permute.xlu2 %1455  ;;  %v1418_v56 = vunpack.i.h.bf16 %v1416_v16  ;;  %v1417_v34 = vunpack.i.l.bf16 %v1416_v16  ;;  %v1028_v16 = vsel %vm465_vm4, %v1027_v14, %v1026_v11  ;;  %v1039_v19 = vperm.slane %v1422_v22, %v1878_v29  ;;  %s1361_s28 = sshll.u32 %s1504_s1, 4  ;;  %s1362_s28 = int_to_ptr.vmem [resolvable:$true] %s1361_s28 }
 0x25b   :  { %v1085_v2 = vsel %vm516_vm5, %v1028_v16, %v1021_v42  ;;  %v1447_v35 = vunpack.i.l.bf16 %v2568_v7  ;;  %v1458_v54 = vunpack.i.h.bf16 %v2575_v26  ;;  %v2887_v42 = vlaneseq }
 0x25c   :  { %v1037_v36 = vperm.slane %v1418_v56, %v1847_v40  ;;  %v1036_v50 = vperm.slane %v1417_v34, %v1836_v33  ;;  %v1457_v56 = vunpack.i.l.bf16 %v2575_v26  ;;  %v1086_v11 = vsel %vm518_vm6, %v1035_v57, %v1085_v2 }
 0x25d   :  { %v1062_v55 = vperm.slane %v1458_v54, %v1881_v37  ;;  %v849_v15 = vshrl.u32 %v2887_v42, 7 }
 0x25e   :  { %v1038_v51 = vsel %vm457_vm2, %v1037_v36, %v1036_v50  ;;  %v1065_v50 = vperm.slane %v1457_v56, %v1847_v40 }
 0x25f   :  { %1261 = vperm.xlu0 %1383, %v784_v17   ;;  %v1044_v17 = vperm.slane %v1427_v30, %v1847_v40  ;;  %v1040_v8 = vsel %vm461_vm3, %v1039_v19, %v1038_v51  ;;  %vm852_vm1 = vcmp.eq.s32.totalorder %v849_v15, %v1464_v4  ;;  %v2888_v4 = vld [vmem:[#allocation33_spill] sm:$0xff] }
 0x260   :  { %1240 = vperm.xlu2 %1381, %v777_v9   ;;  %v1428_v9 = vunpack.i.h.bf16 %v2563_v44  ;;  %v1448_v44 = vunpack.i.h.bf16 %v2568_v7 }
 0x261   :  { %v1431_v62 = vpop.permute.xlu1 %1430  ;;  %v1451_v53 = vpop.permute.xlu0 %1450  ;;  %v1045_v48 = vsel %vm457_vm2, %v1044_v17, %v1043_v60  ;;  %v1080_v17 = vsel %vm457_vm2, %v1079_v58, %v1078_v46 }
 0x262   :  { %v1432_v43 = vunpack.i.l.bf16 %v1431_v62  ;;  %v2613_v6 = vpop.permute.xlu2 %1460  ;;  %v1433_v13 = vunpack.i.h.bf16 %v1431_v62  ;;  %v1041_v38 = vperm.slane %v1428_v9, %v1881_v37  ;;  %v1453_v28 = vunpack.i.h.bf16 %v1451_v53 }
 0x263   :  { %v1452_v59 = vunpack.i.l.bf16 %v1451_v53  ;;  %v1055_v39 = vperm.slane %v1448_v44, %v1881_v37  ;;  %v1462_v3 = vunpack.i.l.bf16 %v2613_v6  ;;  %v1463_v16 = vunpack.i.h.bf16 %v2613_v6 }
 0x264   :  { %v1046_v25 = vperm.slane %v1432_v43, %v1878_v29  ;;  %v1050_v34 = vperm.slane %v1433_v13, %v1836_v33  ;;  %v1042_v26 = vsel %vm465_vm4, %v1041_v38, %v1040_v8  ;;  %v1064_v12 = vperm.slane %v1453_v28, %v1836_v33 }
 0x265   :  { %v1060_v53 = vperm.slane %v1452_v59, %v1878_v29  ;;  %v1087_v43 = vsel %vm520_vm7, %v1042_v26, %v1086_v11  ;;  %v1067_v60 = vperm.slane %v1462_v3, %v1878_v29  ;;  %v1082_v45 = vsel %vm461_vm3, %v1081_v21, %v1080_v17 }
 0x266   :  { %v1047_v14 = vsel %vm461_vm3, %v1046_v25, %v1045_v48  ;;  %v1052_v62 = vsel %vm457_vm2, %v1051_v5, %v1050_v34  ;;  %v1066_v51 = vsel %vm457_vm2, %v1065_v50, %v1064_v12  ;;  %v1069_v49 = vperm.slane %v1463_v16, %v1881_v37 }
 0x267   :  { %v1049_v27 = vsel %vm465_vm4, %v1048_v1, %v1047_v14  ;;  %v1068_v63 = vsel %vm461_vm3, %v1067_v60, %v1066_v51  ;;  %v1503_v38 = vmov 0.0   ;;  %v781_v17 = vmul.f32 %v2521_v18, %v2888_v4 }
 0x268   :  { %1258 = vperm.xlu2 %1381, %v783_v24   ;;  %v1058_v24 = vperm.slane %v1447_v35, %v1847_v40  ;;  %v1088_v13 = vsel %vm522_vm8, %v1049_v27, %v1087_v43  ;;  %v1070_v35 = vsel %vm465_vm4, %v1069_v49, %v1068_v63  ;;  %v1372_v8 = vsel %vm852_vm1, 1.0, %v1503_v38 }
 0x269   :  { %v1441_v0 = vpop.permute.xlu1 %1440  ;;  %v1014_v47 = vpop.permute.xlu0 %1013 }
 0x26a   :  { %v1443_v7 = vunpack.i.h.bf16 %v1441_v0  ;;  %v1442_v10 = vunpack.i.l.bf16 %v1441_v0  ;;  %v1175_v32 = vpop.permute.xlu2 %1174  ;;  %v1083_v6 = vperm.slane %v1014_v47, %v1881_v37 }
 0x26b   :  { %v1267_v46 = vperm.slane %v1175_v32, %v1847_v40 }
 0x26c   :  { %v1057_v30 = vperm.slane %v1443_v7, %v1836_v33  ;;  %v1053_v36 = vperm.slane %v1442_v10, %v1878_v29  ;;  %v1084_v21 = vsel %vm465_vm4, %v1083_v6, %v1082_v45 }
 0x26e   :  { %v1054_v22 = vsel %vm461_vm3, %v1053_v36, %v1052_v62  ;;  %v1059_v41 = vsel %vm457_vm2, %v1058_v24, %v1057_v30 }
 0x26f   :  { %v1056_v23 = vsel %vm465_vm4, %v1055_v39, %v1054_v22  ;;  %v1061_v9 = vsel %vm461_vm3, %v1060_v53, %v1059_v41 }
 0x270   :  { %1264 = vperm.xlu2 %1381, %v2579_v20   ;;  %v1063_v58 = vsel %vm465_vm4, %v1062_v55, %v1061_v9  ;;  %v1089_v20 = vsel %vm524_vm9, %v1056_v23, %v1088_v13 }
 0x271   :  { %v1002_v2 = vpop.permute.xlu1 %1001  ;;  %v1172_v19 = vpop.permute.xlu0 %1171  ;;  %v1090_v5 = vsel %vm526_vm10, %v1063_v58, %v1089_v20 }
 0x272   :  { %v1076_v1 = vperm.slane %v1002_v2, %v1881_v37  ;;  %v1184_v25 = vpop.permute.xlu2 %1183  ;;  %v1266_v57 = vperm.slane %v1172_v19, %v1836_v33  ;;  %v1091_v54 = vsel %vm528_vm11, %v1070_v35, %v1090_v5 }
 0x273   :  { %v1273_v0 = vperm.slane %v1184_v25, %v1836_v33 }
 0x274   :  { %v1268_v52 = vsel %vm457_vm2, %v1267_v46, %v1266_v57  ;;  %v1077_v31 = vsel %vm465_vm4, %v1076_v1, %v1075_v61 }
 0x275   :  { %v1092_v44 = vsel %vm516_vm5, %v1084_v21, %v1077_v31 }
 0x276   :  { %1373 = vmatpush.msk.msra.mxu0 %vm1098_vm0, %v1092_v44 }
 0x278   :  { %1116 = vmatpush.msra.mxu0 %v1091_v54 }
 0x279   :  { %v1178_v28 = vpop.permute.xlu0 %1177  ;;  %1374 = vmatmul.msk.f32.vlgmr.msra.gmra.mxu0 %vm1094_vm13, %v1372_v8  ;;  %v1202_v27 = vpop.permute.xlu1 %1201 }
 0x27a   :  { %v1190_v48 = vpop.permute.xlu2 %1189  ;;  %v1269_v56 = vperm.slane %v1178_v28, %v1878_v29  ;;  %v1283_v22 = vperm.slane %v1202_v27, %v1878_v29 }
 0x27b   :  { %v1276_v14 = vperm.slane %v1190_v48, %v1878_v29 }
 0x27c   :  { %v1270_v34 = vsel %vm461_vm3, %v1269_v56, %v1268_v52 }
 0x281   :  { %v1187_v59 = vpop.permute.xlu0 %1186  ;;  %v1217_v51 = vpop.permute.xlu1 %1216 }
 0x282   :  { %v1274_v47 = vperm.slane %v1187_v59, %v1847_v40  ;;  %v1199_v7 = vpop.permute.xlu2 %1198  ;;  %v1292_v59 = vperm.slane %v1217_v51, %v1881_v37 }
 0x283   :  { %v1281_v39 = vperm.slane %v1199_v7, %v1847_v40 }
 0x284   :  { %v1275_v10 = vsel %vm457_vm2, %v1274_v47, %v1273_v0 }
 0x285   :  { %v1277_v32 = vsel %vm461_vm3, %v1276_v14, %v1275_v10 }
 0x289   :  { %v1196_v11 = vpop.permute.xlu0 %1195  ;;  %v1235_v19 = vpop.permute.xlu1 %1234 }
 0x28a   :  { %v1280_v24 = vperm.slane %v1196_v11, %v1836_v33  ;;  %v1193_v26 = vpop.permute.xlu2 %1192  ;;  %v1302_v14 = vperm.slane %v1235_v19, %v1847_v40 }
 0x28b   :  { %v1278_v55 = vperm.slane %v1193_v26, %v1881_v37 }
 0x28c   :  { %v1282_v3 = vsel %vm457_vm2, %v1281_v39, %v1280_v24 }
 0x28d   :  { %v1279_v36 = vsel %vm465_vm4, %v1278_v55, %v1277_v32  ;;  %v1284_v42 = vsel %vm461_vm3, %v1283_v22, %v1282_v3 }
 0x291   :  { %v1181_v12 = vpop.permute.xlu0 %1180  ;;  %v1244_v58 = vpop.permute.xlu1 %1243 }
 0x292   :  { %v1271_v30 = vperm.slane %v1181_v12, %v1881_v37  ;;  %v1211_v6 = vpop.permute.xlu2 %1210 }
 0x293   :  { %v1288_v38 = vperm.slane %v1211_v6, %v1847_v40 }
 0x294   :  { %v1272_v50 = vsel %vm465_vm4, %v1271_v30, %v1270_v34 }
 0x295   :  { %v1322_v62 = vsel %vm516_vm5, %v1279_v36, %v1272_v50  ;;  %v1308_v36 = vperm.slane %v1244_v58, %v1836_v33 }
 0x299   :  { %v1208_v53 = vpop.permute.xlu0 %1207  ;;  %v1250_v1 = vpop.permute.xlu1 %1249 }
 0x29a   :  { %v1214_v13 = vpop.permute.xlu2 %1213  ;;  %v1287_v5 = vperm.slane %v1208_v53, %v1836_v33 }
 0x29b   :  { %v1290_v54 = vperm.slane %v1214_v13, %v1878_v29 }
 0x29c   :  { %v1289_v48 = vsel %vm457_vm2, %v1288_v38, %v1287_v5 }
 0x29d   :  { %v1291_v11 = vsel %vm461_vm3, %v1290_v54, %v1289_v48 }
 0x29e   :  { %v1293_v27 = vsel %vm465_vm4, %v1292_v59, %v1291_v11 }
 0x2a1   :  { %v1205_v41 = vpop.permute.xlu0 %1204 }
 0x2a2   :  { %v1285_v43 = vperm.slane %v1205_v41, %v1881_v37  ;;  %v1223_v61 = vpop.permute.xlu2 %1222 }
 0x2a3   :  { %v1295_v0 = vperm.slane %v1223_v61, %v1847_v40 }
 0x2a4   :  { %v1286_v15 = vsel %vm465_vm4, %v1285_v43, %v1284_v42 }
 0x2a5   :  { %v2722_v16 = vsel %vm518_vm6, %v1286_v15, %v1322_v62 }
 0x2a6   :  { %v1324_v42 = vsel %vm520_vm7, %v1293_v27, %v2722_v16  ;;  %vm1354_vm7 = vcmask 39936  }
 0x2a9   :  { %v1220_v2 = vpop.permute.xlu0 %1219 }
 0x2aa   :  { %v1232_v20 = vpop.permute.xlu2 %1231  ;;  %v1294_v28 = vperm.slane %v1220_v2, %v1836_v33 }
 0x2ab   :  { %v1301_v7 = vperm.slane %v1232_v20, %v1836_v33 }
 0x2ac   :  { %v1296_v39 = vsel %vm457_vm2, %v1295_v0, %v1294_v28 }
 0x2ad   :  { %v1303_v22 = vsel %vm457_vm2, %v1302_v14, %v1301_v7 }
 0x2b1   :  { %v1226_v45 = vpop.permute.xlu0 %1225 }
 0x2b2   :  { %v1238_v25 = vpop.permute.xlu2 %1237  ;;  %v1297_v56 = vperm.slane %v1226_v45, %v1878_v29 }
 0x2b3   :  { %v1304_v24 = vperm.slane %v1238_v25, %v1878_v29 }
 0x2b4   :  { %v1298_v26 = vsel %vm461_vm3, %v1297_v56, %v1296_v39 }
 0x2b5   :  { %v1305_v43 = vsel %vm461_vm3, %v1304_v24, %v1303_v22 }
 0x2b9   :  { %v1229_v46 = vpop.permute.xlu0 %1228 }
 0x2ba   :  { %v1241_v52 = vpop.permute.xlu2 %1240  ;;  %v1299_v47 = vperm.slane %v1229_v46, %v1881_v37 }
 0x2bb   :  { %v1306_v55 = vperm.slane %v1241_v52, %v1881_v37 }
 0x2bc   :  { %v1300_v50 = vsel %vm465_vm4, %v1299_v47, %v1298_v26 }
 0x2c1   :  { %v1247_v57 = vpop.permute.xlu0 %1246 }
 0x2c2   :  { %v1259_v35 = vpop.permute.xlu2 %1258  ;;  %v1309_v3 = vperm.slane %v1247_v57, %v1847_v40 }
 0x2c3   :  { %v1316_v41 = vperm.slane %v1259_v35, %v1847_v40 }
 0x2c4   :  { %v1310_v15 = vsel %vm457_vm2, %v1309_v3, %v1308_v36 }
 0x2c9   :  { %v1256_v31 = vpop.permute.xlu0 %1255 }
 0x2ca   :  { %v1315_v12 = vperm.slane %v1256_v31, %v1836_v33  ;;  %v1311_v33 = vperm.slane %v1250_v1, %v1878_v29 }
 0x2cc   :  { %v1317_v4 = vsel %vm457_vm2, %v1316_v41, %v1315_v12  ;;  %v1312_v51 = vsel %vm461_vm3, %v1311_v33, %v1310_v15  ;;  %vm2890_vm2 = vmmov %vm2889_vm15 }
 0x2d1   :  { %v1262_v10 = vpop.permute.xlu0 %1261 }
 0x2d2   :  { %v1318_v62 = vperm.slane %v1262_v10, %v1878_v29 }
 0x2d4   :  { %v1319_v40 = vsel %vm461_vm3, %v1318_v62, %v1317_v4 }
 0x2f6   :  { %v1118_v60 = vpop.f32.mrf.mxu0 }
 0x2f7   :  { %v1121_v23 = vmul.f32 %v1118_v60, %v1118_v60 }
 0x2f9   :  { %v1123_v9 = vsel %vm1122_vm12, %v1121_v23, 0.0  ;;  %v1265_v23 = vpop.permute.xlu2 %1264 }
 0x2fa   :  { %1124 = vadd.xlane.f32.xlu1 %v1123_v9  ;;  %v1325_v9 = vsel %vm522_vm8, %v1300_v50, %v1324_v42  ;;  %v1320_v16 = vperm.slane %v1265_v23, %v1881_v37 }
 0x2fc   :  { %v1321_v29 = vsel %vm465_vm4, %v1320_v16, %v1319_v40 }
 0x313   :  { %1252 = vperm.xlu1 %1382, %v781_v17  }
 0x36d   :  { %v1125_v49 = vpop.xlane.xlu1 %1124 }
 0x36e   :  { %v1126_v63 = vmax.f32 %v1125_v49, 1e-24 }
 0x370   :  { %1473 = vrsqrt.f32 %v1126_v63  ;;  %vm1133_vm6 = vweird.f32 %v1126_v63 }
 0x376   :  { %v1474_v18 = vpop.eup %1473 }
 0x377   :  { %v1128_v21 = vmul.f32 %v1474_v18, %v1126_v63  ;;  %vm1134_vm5 = vweird.f32 %v1474_v18 }
 0x378   :  { %vm1135_vm14 = vmor %vm1133_vm6, %vm1134_vm5 }
 0x379   :  { %v1129_v44 = vmul.f32 %v1474_v18, %v1128_v21 }
 0x37b   :  { %v1130_v8 = vmul.f32 0.5, %v1129_v44 }
 0x37d   :  { %v1131_v34 = vsub.f32 1.5, %v1130_v8 }
 0x37f   :  { %v1132_v32 = vmul.f32 %v1474_v18, %v1131_v34 }
 0x381   :  { %v1136_v30 = vsel %vm1135_vm14, %v1474_v18, %v1132_v32 }
 0x382   :  { %v1137_v53 = vmul.f32 %v1136_v30, %v1118_v60  ;;  %v1307_v60 = vsel %vm465_vm4, %v1306_v55, %v1305_v43 }
 0x383   :  { %v1326_v2 = vsel %vm524_vm9, %v1307_v60, %v1325_v9 }
 0x384   :  { %1375 = vmatpush.xpose.msk.msra.mxu1 %vm2889_vm15, %v1137_v53 }
 0x385   :  { %v1253_v17 = vpop.permute.xlu1 %1252 }
 0x386   :  { %v1313_v6 = vperm.slane %v1253_v17, %v1881_v37 }
 0x388   :  { %v1314_v13 = vsel %vm465_vm4, %v1313_v6, %v1312_v51 }
 0x389   :  { %v1327_v19 = vsel %vm526_vm10, %v1314_v13, %v1326_v2 }
 0x38a   :  { %v1328_v61 = vsel %vm528_vm11, %v1321_v29, %v1327_v19 }
 0x38b   :  { %1376 = vmatmul.msk.f32.vlgmr.msra.gmra.mxu1 %vm2890_vm2, %v1328_v61 }
 0x408   :  { %v1351_v37 = vpop.f32.mrf.mxu1 }
 0x409   :  { %1355 = vst.msk [vmem:[#allocation3] sm:$0xff] %vm1354_vm7, %v1351_v37 }
 0x40a   :  { %1366 = dma.vmem_to_hbm [thread:$0]  %s1362_s28, 128, %s1364_s5, [#allocation4]  }
 0x40b   :  { %1499 = dma.done.wait [#allocation4], 128  }
 0x40c   :  { %1500 = vsyncadd [#allocation4], 4294967168 }
 0x40d   :  { %1371 = vsyncpa [#allocation4], 1 }

</bundles_post_ra>
